<compile_context>
chip_gen: v6e
topology: v6e:2x2x1
jax: 0.10.0
libtpu: 0.0.40
codegen_flags: <defaults>
</compile_context>

<pallas_src>
import numpy as np
import jax
import jax.numpy as jnp
from jax import lax
from jax.experimental import pallas as pl
from jax.experimental.pallas import tpu as pltpu

LANE = 128


def _round_up(n, m):
    return ((n + m - 1) // m) * m


def _conv3x3_im2col_kernel(xpad_ref, w_ref, out_ref):
    # xpad_ref: (1, H+2, W+2, Cin_p)   bf16, spatially pre-padded, channel-padded to 128
    # w_ref   : (9*Cin_p, Cout_p)      bf16, HWIO taps flattened (tap-major, then ci)
    # out_ref : (1, H*W, Cout_p)       f32, lane-dense slab
    H = xpad_ref.shape[1] - 2
    W = xpad_ref.shape[2] - 2
    Cp = xpad_ref.shape[3]

    x = xpad_ref[0]                                   # (H+2, W+2, Cp)
    # im2col: 9 shifted views concatenated along the (128-aligned) lane axis.
    # Lane dim (Cp) is untouched by the slices; the (H, W, Cp) -> (H*W, Cp) merge is a
    # layout no-op when W is a multiple of 8.
    taps = [x[kh:kh + H, kw:kw + W, :].reshape(H * W, Cp)
            for kh in range(3) for kw in range(3)]
    patches = jnp.concatenate(taps, axis=-1)          # (H*W, 9*Cp) bf16

    # Single MXU matmul with f32 accumulation.
    out = jnp.dot(patches, w_ref[...], preferred_element_type=jnp.float32)
    out_ref[0] = out.astype(out_ref.dtype)            # (H*W, Cout_p), unmasked 128-lane stores


def downsample_forward(x_nchw, w_oihw):
    """Downsample forward.  x_nchw: (B, C, H, W) f32, w_oihw: (C//2, C, 3, 3) f32.
    Returns (B, 2*C, H//2, W//2) f32."""
    B, C, H, W = x_nchw.shape
    Cout = w_oihw.shape[0]                            # = C // 2
    assert H % 2 == 0 and W % 2 == 0, "PixelUnshuffle(2) needs even H, W"

    Cin_p = _round_up(C, LANE)
    Cout_p = _round_up(Cout, LANE)

    # One fused materialization: transpose + spatial pad + channel pad + bf16 cast.
    x_nhwc = jnp.transpose(x_nchw, (0, 2, 3, 1))                               # (B, H, W, C)
    x_prep = jnp.pad(x_nhwc, ((0, 0), (1, 1), (1, 1), (0, Cin_p - C))
                     ).astype(jnp.bfloat16)                                    # (B, H+2, W+2, Cin_p)

    # Weight: OIHW -> HWIO, channel-pad both sides, flatten taps to (9*Cin_p, Cout_p).
    w_hwio = jnp.transpose(w_oihw, (2, 3, 1, 0))                               # (3, 3, C, Cout)
    w_hwio = jnp.pad(w_hwio, ((0, 0), (0, 0), (0, Cin_p - C), (0, Cout_p - Cout)))
    w_mat = w_hwio.reshape(9 * Cin_p, Cout_p).astype(jnp.bfloat16)

    out_slab = pl.pallas_call(
        _conv3x3_im2col_kernel,
        out_shape=jax.ShapeDtypeStruct((B, H * W, Cout_p), jnp.float32),
        grid_spec=pltpu.PrefetchScalarGridSpec(
            num_scalar_prefetch=0,
            grid=(B,),
            in_specs=[
                pl.BlockSpec((1, H + 2, W + 2, Cin_p), lambda b: (b, 0, 0, 0)),
                pl.BlockSpec((9 * Cin_p, Cout_p), lambda b: (0, 0)),   # constant -> stays resident
            ],
            out_specs=pl.BlockSpec((1, H * W, Cout_p), lambda b: (b, 0, 0)),
        ),
        compiler_params=pltpu.CompilerParams(
            dimension_semantics=("parallel",),
            vmem_limit_bytes=32 * 1024 * 1024,
        ),
    )(x_prep, w_mat)

    # Wrapper-side layout: drop channel padding, PixelUnshuffle(2), emit NCHW.
    # out_slab rows are flattened (h, w); out[b, c*4 + i*2 + j, hh, ww] = conv[b, c, 2hh+i, 2ww+j].
    y = out_slab[:, :, :Cout].reshape(B, H // 2, 2, W // 2, 2, Cout)           # (b, hh, i, ww, j, c)
    y = jnp.transpose(y, (0, 5, 2, 4, 1, 3))                                   # (b, c, i, j, hh, ww)
    return y.reshape(B, Cout * 4, H // 2, W // 2)


def downsample_reference(x_nchw, w_oihw):
    """Pure-JAX f32 reference (XLA conv + pixel-unshuffle)."""
    y = lax.conv_general_dilated(
        x_nchw, w_oihw, window_strides=(1, 1), padding=((1, 1), (1, 1)),
        dimension_numbers=("NCHW", "OIHW", "NCHW"))
    B, Co, H, W = y.shape
    y = y.reshape(B, Co, H // 2, 2, W // 2, 2)
    y = jnp.transpose(y, (0, 1, 3, 5, 2, 4))
    return y.reshape(B, Co * 4, H // 2, W // 2)


if __name__ == "__main__":
    # Downsample(n_feat=4) on a (2, 4, 16, 16) input -> output (2, 8, 8, 8).
    B, C, H, W = 2, 4, 16, 16
    Cout = C // 2

    key = jax.random.PRNGKey(0)
    k_x, k_w = jax.random.split(key)
    x = jax.random.normal(k_x, (B, C, H, W), dtype=jnp.float32)
    w = 0.1 * jax.random.normal(k_w, (Cout, C, 3, 3), dtype=jnp.float32)   # Conv2d weight, OIHW, bias=False

    out = jax.block_until_ready(downsample_forward(x, w))
    ref = jax.block_until_ready(downsample_reference(x, w))

    assert out.shape == (B, 2 * C, H // 2, W // 2), out.shape
    # Kernel matmuls run in bf16 (f32 accumulation); compare to the f32 reference at bf16 tolerance.
    np.testing.assert_allclose(np.asarray(out), np.asarray(ref), rtol=2e-2, atol=2e-2)

    print("KERNEL_OK")
</pallas_src>

<mosaic_0001>
module attributes {stable_mosaic.version = 11 : i64} {
  func.func @_conv3x3_im2col_kernel(%arg0: i32, %arg1: memref<1x18x18x128xbf16, #tpu.memory_space<vmem>>, %arg2: memref<1152x128xbf16, #tpu.memory_space<vmem>>, %arg3: memref<1x256x128xf32, #tpu.memory_space<vmem>>) attributes {dimension_semantics = [#tpu.dimension_semantics<parallel>], iteration_bounds = array<i64: 2>, scalar_prefetch = 0 : i64, scratch_operands = 0 : i64, tpu.core_type = #tpu.core_type<tc>, window_params = [{transform_indices = @transform_0, window_bounds = array<i64: 1, 18, 18, 128>}, {pipeline_mode = #tpu.pipeline_mode<synchronous>, transform_indices = @transform_1, window_bounds = array<i64: 1152, 128>}, {transform_indices = @transform_2, window_bounds = array<i64: 1, 256, 128>}]} {
    %c0 = arith.constant 0 : index
    %c0_0 = arith.constant 0 : index
    %c0_1 = arith.constant 0 : index
    %c0_2 = arith.constant 0 : index
    %0 = vector.load %arg1[%c0, %c0_0, %c0_1, %c0_2] : memref<1x18x18x128xbf16, #tpu.memory_space<vmem>>, vector<1x18x18x128xbf16>
    %1 = vector.shape_cast %0 : vector<1x18x18x128xbf16> to vector<18x18x128xbf16>
    %2 = vector.extract_strided_slice %1 {offsets = [0, 0, 0], sizes = [16, 16, 128], strides = [1, 1, 1]} : vector<18x18x128xbf16> to vector<16x16x128xbf16>
    %3 = vector.shape_cast %2 : vector<16x16x128xbf16> to vector<256x128xbf16>
    %4 = vector.extract_strided_slice %1 {offsets = [0, 1, 0], sizes = [16, 16, 128], strides = [1, 1, 1]} : vector<18x18x128xbf16> to vector<16x16x128xbf16>
    %5 = vector.shape_cast %4 : vector<16x16x128xbf16> to vector<256x128xbf16>
    %6 = vector.extract_strided_slice %1 {offsets = [0, 2, 0], sizes = [16, 16, 128], strides = [1, 1, 1]} : vector<18x18x128xbf16> to vector<16x16x128xbf16>
    %7 = vector.shape_cast %6 : vector<16x16x128xbf16> to vector<256x128xbf16>
    %8 = vector.extract_strided_slice %1 {offsets = [1, 0, 0], sizes = [16, 16, 128], strides = [1, 1, 1]} : vector<18x18x128xbf16> to vector<16x16x128xbf16>
    %9 = vector.shape_cast %8 : vector<16x16x128xbf16> to vector<256x128xbf16>
    %10 = vector.extract_strided_slice %1 {offsets = [1, 1, 0], sizes = [16, 16, 128], strides = [1, 1, 1]} : vector<18x18x128xbf16> to vector<16x16x128xbf16>
    %11 = vector.shape_cast %10 : vector<16x16x128xbf16> to vector<256x128xbf16>
    %12 = vector.extract_strided_slice %1 {offsets = [1, 2, 0], sizes = [16, 16, 128], strides = [1, 1, 1]} : vector<18x18x128xbf16> to vector<16x16x128xbf16>
    %13 = vector.shape_cast %12 : vector<16x16x128xbf16> to vector<256x128xbf16>
    %14 = vector.extract_strided_slice %1 {offsets = [2, 0, 0], sizes = [16, 16, 128], strides = [1, 1, 1]} : vector<18x18x128xbf16> to vector<16x16x128xbf16>
    %15 = vector.shape_cast %14 : vector<16x16x128xbf16> to vector<256x128xbf16>
    %16 = vector.extract_strided_slice %1 {offsets = [2, 1, 0], sizes = [16, 16, 128], strides = [1, 1, 1]} : vector<18x18x128xbf16> to vector<16x16x128xbf16>
    %17 = vector.shape_cast %16 : vector<16x16x128xbf16> to vector<256x128xbf16>
    %18 = vector.extract_strided_slice %1 {offsets = [2, 2, 0], sizes = [16, 16, 128], strides = [1, 1, 1]} : vector<18x18x128xbf16> to vector<16x16x128xbf16>
    %19 = vector.shape_cast %18 : vector<16x16x128xbf16> to vector<256x128xbf16>
    %20 = tpu.concatenate %3, %5, %7, %9, %11, %13, %15, %17, %19 in 1 : vector<256x128xbf16>, vector<256x128xbf16>, vector<256x128xbf16>, vector<256x128xbf16>, vector<256x128xbf16>, vector<256x128xbf16>, vector<256x128xbf16>, vector<256x128xbf16>, vector<256x128xbf16> -> vector<256x1152xbf16>
    %c0_3 = arith.constant 0 : index
    %c0_4 = arith.constant 0 : index
    %21 = vector.load %arg2[%c0_3, %c0_4] : memref<1152x128xbf16, #tpu.memory_space<vmem>>, vector<1152x128xbf16>
    %cst = arith.constant dense<0.000000e+00> : vector<256x128xf32>
    %22 = tpu.matmul %20, %21, %cst {dimension_numbers = #tpu.dot_dimension_numbers<[1], [0], [0], [1], [0, 0, 1, 1], [], []>} : vector<256x1152xbf16>, vector<1152x128xbf16>, vector<256x128xf32> -> vector<256x128xf32>
    %c0_5 = arith.constant 0 : index
    %c0_6 = arith.constant 0 : index
    %c0_7 = arith.constant 0 : index
    %23 = vector.load %arg3[%c0_5, %c0_6, %c0_7] : memref<1x256x128xf32, #tpu.memory_space<vmem>>, vector<1x256x128xf32>
    %24 = vector.shape_cast %23 : vector<1x256x128xf32> to vector<256x128xf32>
    %25 = vector.shape_cast %22 : vector<256x128xf32> to vector<1x256x128xf32>
    tpu.vector_store %arg3[%c0_5, %c0_6, %c0_7], %25 {strides = array<i32>} : memref<1x256x128xf32, #tpu.memory_space<vmem>>, vector<1x256x128xf32>,
    return
  }
  func.func @transform_0(%arg0: i32) -> (i32, i32, i32, i32) {
    %c0_i32 = arith.constant 0 : i32
    %c0_i32_0 = arith.constant 0 : i32
    %c0_i32_1 = arith.constant 0 : i32
    %c0_i32_2 = arith.constant 0 : i32
    return %arg0, %c0_i32, %c0_i32_0, %c0_i32_1 : i32, i32, i32, i32
  }
  func.func @transform_1(%arg0: i32) -> (i32, i32) {
    %c0_i32 = arith.constant 0 : i32
    %c0_i32_0 = arith.constant 0 : i32
    %c0_i32_1 = arith.constant 0 : i32
    return %c0_i32, %c0_i32_0 : i32, i32
  }
  func.func @transform_2(%arg0: i32) -> (i32, i32, i32) {
    %c0_i32 = arith.constant 0 : i32
    %c0_i32_0 = arith.constant 0 : i32
    %c0_i32_1 = arith.constant 0 : i32
    return %arg0, %c0_i32, %c0_i32_0 : i32, i32, i32
  }
}

</mosaic_0001>

<bundles_post_ra>
// kernel: tpu_custom_call.1
= control target key start
LH: loop header
LB: loop body
LE: loop exit
PB: predicated region body
PF: predicated region fallthrough
CT: control target
= control target key end

     0   :  { %7 = vsyncpa [#allocation3], 0  ;;  %s4900_s0 = inlined_call_operand.vmem [shape: bf16[2,18,18,128], index: 0, kind: input, shape index: {}]   ;;  %s4901_s1 = inlined_call_operand.vmem [shape: bf16[1152,128], index: 1, kind: input, shape index: {}]   ;;  %s4902_s2 = inlined_call_operand.hbm [shape: f32[2,256,128], index: 2, kind: output, shape index: {}]  }
   0x1   :  { %9 = vsyncpa [#allocation3 + $0x1], 0  ;;  %s3436_s9 = smov 0   ;;  %s3438_s10 = smov 0  }
   0x2   :  { %s3440_s11 = smov 0   ;;  %s3442_s12 = smov 0  }
   0x3 LB: > { %s3457_s13 = sadd.s32 4294967295, %s3416_s12   ;;  %s2520_s14 = sadd.s32 4294967294, %s3416_s12   ;;  %s3416_s12 = sphi %s3442_s12, %s4966_s12   ;;  %s3412_s11 = sphi %s3440_s11, %s4965_s11   ;;  %s3408_s10 = sphi %s3438_s10, %s4964_s10   ;;  %s3404_s9 = sphi %s3436_s9, %s4963_s9  }
   0x4   : > { %s3461_s15 = sadd.s32 1, %s3416_s12   ;;  %s69_s16 = sadd.s32 1, %s3412_s11 }
   0x5   : > { %s66_s17 = ssub.s32 %s3416_s12, %s3461_s15  ;;  %p79_p0 = scmp.ne.s32.totalorder %s3412_s11, %s3408_s10 }
   0x6   : > { %p67_p1 = scmp.eq.s32.totalorder %s66_s17, 0  ;;  %p80_p2 = scmp.eq.s32.totalorder %s3457_s13, 1 }
   0x7   : > { %p85_p3 = scmp.ne.s32.totalorder %s3408_s10, %s3404_s9  ;;  %p86_p4 = scmp.eq.s32.totalorder %s2520_s14, 1 }
   0x8   : > { %s3472_s18 = scalar_select %p67_p1, %s3412_s11, %s69_s16  }
   0x9   : > { %p3474_p5 = por %p80_p2, %p79_p0  ;;  %p3478_p6 = por %p86_p4, %p85_p3 }
   0xa   : > { %p2523_p7 = scmp.ge.s32.totalorder %s3416_s12, 1  ;;  %p115_p8 = scmp.lt.s32.totalorder %s3416_s12, 3 }
   0xc   : > { %p116_p9 = pnand %p2523_p7, %p115_p8 }
   0xe   : > { %119 = sbr.rel (%p116_p9) target bundleno = 557 (0x22d), region = 28 }
  0x13   : > { %v3254_v0 = vld [vmem:[%s4901_s1 + $0x78] sm:$0xff]   ;;  %p137_p10 = scmp.lt.s32.totalorder %s3457_s13, 1  ;;  %v3256_v2 = vld [vmem:[%s4901_s1 + $0x70] sm:$0xff]   ;;  %v3258_v4 = vld [vmem:[%s4901_s1 + $0x68] sm:$0xff]   ;;  %vm197_vm0 = vsmask.f32 3328 }
  0x14   : > { %v3255_v1 = vld [vmem:[%s4901_s1 + $0x38] sm:$0xff]   ;;  %2676 = vmatprep.subr.bf16.mxu0 %v3254_v0  ;;  %3196 = vmatprep.subr.bf16.mxu1 %v3254_v0  ;;  %v3257_v3 = vld [vmem:[%s4901_s1 + $0x30] sm:$0xff]   ;;  %v3259_v5 = vld [vmem:[%s4901_s1 + $0x28] sm:$0xff]   ;;  %vm198_vm1 = vsmask.f32 7440  ;;  %vm632_vm3 = vcmask 1042432  }
  0x15   : > { %2677 = vmatpush3.bf16.msra.mxu0 %v3255_v1  ;;  %3204 = vmatpush3.bf16.msra.mxu1 %v3255_v1  ;;  %s138_s3 = scalar_select %p137_p10, %s3457_s13, 1  ;;  %v3260_v6 = vld [vmem:[%s4901_s1 + $0x60] sm:$0xff]   ;;  %v3262_v8 = vld [vmem:[%s4901_s1 + $0x58] sm:$0xff]   ;;  %v3264_v10 = vld [vmem:[%s4901_s1 + $0x50] sm:$0xff]   ;;  %vm633_vm4 = vcmask 1046532  }
  0x16   : > { %2678 = vmatprep.subr.bf16.mxu0 %v3256_v2  ;;  %3197 = vmatprep.subr.bf16.mxu1 %v3256_v2  ;;  %v3261_v7 = vld [vmem:[%s4901_s1 + $0x20] sm:$0xff]   ;;  %v3263_v9 = vld [vmem:[%s4901_s1 + $0x18] sm:$0xff]   ;;  %v3265_v14 = vld [vmem:[%s4901_s1 + $0x10] sm:$0xff]   ;;  %s2675_s27 = sshll.u32 %s3457_s13, 12  ;;  %s3418_s5 = smov [#allocation2]  }
  0x17   : > { %s3212_s8 = smul.u32 216, %s138_s3  ;;  %v3266_v17 = vld [vmem:[%s4901_s1 + $0x48] sm:$0xff]   ;;  %v3268_v35 = vld [vmem:[%s4901_s1 + $0x40] sm:$0xff]   ;;  %vm3560_vm2 = vmor %vm197_vm0, %vm198_vm1  ;;  %s4853_s3 = scalar_lea.hbm %s4902_s2, %s2675_s27 }
  0x18   : > { %v3267_v30 = vld [vmem:[%s4901_s1 + $0x8] sm:$0xff]   ;;  %v3269_v49 = vld [vmem:[%s4901_s1] sm:$0xff]   ;;  %v3272_v56 = vld [vmem:[%s4901_s1 + $0xf8] sm:$0xff]   ;;  %s3360_s6 = sshll.u32 %s3418_s5, 4  ;;  %s3361_s6 = int_to_ptr.vmem [resolvable:$false] %s3360_s6 }
  0x19   : > { %2679 = vmatpush3.bf16.msra.mxu0 %v3257_v3  ;;  %3205 = vmatpush3.bf16.msra.mxu1 %v3257_v3  ;;  %s3516_s24 = scalar_lea.vmem %s4900_s0, %s3212_s8  ;;  %v3275_v59 = vld [vmem:[%s4901_s1 + $0x178] sm:$0xff]   ;;  %vm3751_vm5 = vmor %vm632_vm3, %vm633_vm4  ;;  %s3362_s7 = scalar_lea.vmem %s3361_s6, 8192 }
  0x1a   : > { %2680 = vmatprep.subr.bf16.mxu0 %v3258_v4  ;;  %3198 = vmatprep.subr.bf16.mxu1 %v3258_v4  ;;  %v3525_v11 = vld [vmem:[%s3516_s24] sm:$0xf]  ;;  %v3528_v12 = vld [vmem:[%s3516_s24 + $0x4] sm:$0xf]  ;;  %v3531_v13 = vld [vmem:[%s3516_s24 + $0x8] sm:$0x1] }
  0x1b   : > { %v201_v15 = vshrl.u32 %v3525_v11, 16  ;;  %v204_v16 = vshll.u32 %v3525_v11, 16  ;;  %v210_v18 = vshll.u32 %v3528_v12, 16  ;;  %v214_v19 = vshrl.u32 %v3528_v12, 16  ;;  %v3545_v21 = vld [vmem:[%s3516_s24 + $0x90] sm:$0xf] }
  0x1c   : > { %v220_v20 = vshll.u32 %v3531_v13, 16  ;;  %v180_v24 = vld [vmem:[%s3516_s24 + $0x94] sm:$0xf]  ;;  %v2526_v27 = vrot.slane %v3525_v11, 9  ;;  %v181_v28 = vld [vmem:[%s3516_s24 + $0x98] sm:$0x1]  ;;  %v2544_v58 = vcombine.low %v3525_v11, %v3528_v12 }
  0x1d   : > { %2681 = vmatpush3.bf16.msra.mxu0 %v3259_v5  ;;  %3206 = vmatpush3.bf16.msra.mxu1 %v3259_v5  ;;  %v203_v22 = vrot.slane %v201_v15, 4  ;;  %v206_v23 = vrot.slane %v204_v16, 5  ;;  %v212_v25 = vrot.slane %v210_v18, 5  ;;  %v216_v26 = vrot.slane %v214_v19, 4  ;;  %v3582_v60 = vld [vmem:[%s3516_s24 + $0xc] sm:$0xf] }
  0x1e   : > { %2682 = vmatprep.subr.bf16.mxu0 %v3260_v6  ;;  %3199 = vmatprep.subr.bf16.mxu1 %v3260_v6  ;;  %v489_v29 = vshrl.u32 %v3545_v21, 16  ;;  %v222_v32 = vrot.slane %v220_v20, 5  ;;  %v492_v33 = vshll.u32 %v3545_v21, 16  ;;  %v498_v34 = vshll.u32 %v180_v24, 16  ;;  %v3585_v61 = vld [vmem:[%s3516_s24 + $0x10] sm:$0xf] }
  0x1f   : > { %v207_v31 = vor.u32 %v206_v23, %v203_v22  ;;  %v217_v37 = vor.u32 %v216_v26, %v212_v25  ;;  %v502_v39 = vshrl.u32 %v180_v24, 16  ;;  %v508_v40 = vshll.u32 %v181_v28, 16  ;;  %v3273_v63 = vld [vmem:[%s4901_s1 + $0xb8] sm:$0xff]   ;;  %v3593_v0 = vld [vmem:[%s3516_s24 + $0x14] sm:$0x1]  ;;  %v3304_v11 = vld [vmem:[%s4901_s1 + $0x160] sm:$0xff]  }
  0x20   : > { %v491_v38 = vrot.slane %v489_v29, 4  ;;  %v637_v42 = vrot.slane %v3528_v12, 5  ;;  %v494_v43 = vrot.slane %v492_v33, 5  ;;  %v500_v44 = vrot.slane %v498_v34, 5  ;;  %v3274_v6 = vld [vmem:[%s4901_s1 + $0xf0] sm:$0xff]   ;;  %v3277_v15 = vld [vmem:[%s4901_s1 + $0x138] sm:$0xff]  }
  0x21   : > { %2683 = vmatpush3.bf16.msra.mxu0 %v3261_v7  ;;  %3207 = vmatpush3.bf16.msra.mxu1 %v3261_v7  ;;  %v208_v41 = vrot.slane %v207_v31, 4  ;;  %v218_v45 = vrot.slane %v217_v37, 4  ;;  %v640_v46 = vrot.slane %v3531_v13, 5  ;;  %v504_v47 = vrot.slane %v502_v39, 4  ;;  %v184_v19 = vld [vmem:[%s3516_s24 + $0xa4] sm:$0x1] }
  0x22   : > { %2684 = vmatprep.subr.bf16.mxu0 %v3262_v8  ;;  %3200 = vmatprep.subr.bf16.mxu1 %v3262_v8  ;;  %v510_v48 = vrot.slane %v508_v40, 5  ;;  %v495_v51 = vor.u32 %v494_v43, %v491_v38  ;;  %v225_v1 = vshrl.u32 %v3582_v60, 16  ;;  %v228_v2 = vshll.u32 %v3582_v60, 16  ;;  %v3280_v37 = vld [vmem:[%s4901_s1 + $0xe8] sm:$0xff]  }
  0x23   : > { %v213_v50 = vsel %vm3560_vm2, %v208_v41, %v212_v25  ;;  %v223_v52 = vsel %vm3560_vm2, %v218_v45, %v222_v32  ;;  %v505_v53 = vor.u32 %v504_v47, %v500_v44  ;;  %v234_v3 = vshll.u32 %v3585_v61, 16  ;;  %v3633_v47 = vld [vmem:[%s3516_s24 + $0x18] sm:$0xf] }
  0x24   : > { %v2560_v54 = vcombine.low %v213_v50, %v223_v52  ;;  %v496_v55 = vrot.slane %v495_v51, 4  ;;  %v3601_v5 = vcombine.low %v3545_v21, %v180_v24  ;;  %v238_v7 = vshrl.u32 %v3585_v61, 16  ;;  %v3276_v24 = vld [vmem:[%s4901_s1 + $0xb0] sm:$0xff]   ;;  %v3281_v51 = vld [vmem:[%s4901_s1 + $0xa8] sm:$0xff]   ;;  %v3644_v52 = vld [vmem:[%s3516_s24 + $0x20] sm:$0x1] }
  0x25   : > { %2685 = vmatpush3.bf16.msra.mxu0 %v3263_v9  ;;  %3208 = vmatpush3.bf16.msra.mxu1 %v3263_v9  ;;  %v506_v57 = vrot.slane %v505_v53, 4  ;;  %v244_v8 = vshll.u32 %v3593_v0, 16  ;;  %v182_v9 = vld [vmem:[%s3516_s24 + $0x9c] sm:$0xf]  ;;  %v227_v16 = vrot.slane %v225_v1, 4  ;;  %v236_v18 = vrot.slane %v234_v3, 5 }
  0x26   : > { %2686 = vmatprep.subr.bf16.mxu0 %v3264_v10  ;;  %3201 = vmatprep.subr.bf16.mxu1 %v3264_v10  ;;  %v501_v62 = vsel %vm3560_vm2, %v496_v55, %v500_v44  ;;  %v183_v10 = vld [vmem:[%s3516_s24 + $0xa0] sm:$0xf]  ;;  %v240_v20 = vrot.slane %v238_v7, 4  ;;  %v513_v22 = vshrl.u32 %v182_v9, 16  ;;  %v516_v23 = vshll.u32 %v182_v9, 16 }
  0x27   : > { %1639 = vmatprep.mubr.bf16.mxu0 %v2560_v54  ;;  %v511_v4 = vsel %vm3560_vm2, %v506_v57, %v510_v48  ;;  %v246_v21 = vrot.slane %v244_v8, 5  ;;  %v522_v26 = vshll.u32 %v183_v10, 16  ;;  %v526_v28 = vshrl.u32 %v183_v10, 16  ;;  %v3636_v48 = vld [vmem:[%s3516_s24 + $0x1c] sm:$0xf]  ;;  %v3282_v1 = vld [vmem:[%s4901_s1 + $0xe0] sm:$0xff]  }
  0x28   : > { %v532_v29 = vshll.u32 %v184_v19, 16  ;;  %v515_v31 = vrot.slane %v513_v22, 4  ;;  %v518_v32 = vrot.slane %v516_v23, 5  ;;  %v3628_v44 = vcombine.low %v3582_v60, %v3585_v61 }
  0x29   : > { %2687 = vmatpush3.bf16.msra.mxu0 %v3265_v14  ;;  %3209 = vmatpush3.bf16.msra.mxu1 %v3265_v14  ;;  %v3610_v14 = vcombine.low %v501_v62, %v511_v4  ;;  %v524_v34 = vrot.slane %v522_v26, 5  ;;  %v3630_v45 = vcombine.low %v182_v9, %v183_v10  ;;  %v249_v53 = vshrl.u32 %v3633_v47, 16  ;;  %v3287_v62 = vld [vmem:[%s4901_s1 + $0x170] sm:$0xff]  }
  0x2a   : > { %2688 = vmatprep.subr.bf16.mxu0 %v3266_v17  ;;  %3202 = vmatprep.subr.bf16.mxu1 %v3266_v17  ;;  %v230_v17 = vrot.slane %v228_v2, 5  ;;  %v519_v39 = vor.u32 %v518_v32, %v515_v31  ;;  %v534_v40 = vrot.slane %v532_v29, 5  ;;  %v252_v54 = vshll.u32 %v3633_v47, 16  ;;  %v187_v10 = vld [vmem:[%s3516_s24 + $0xb0] sm:$0x1] }
  0x2b   : > { %4921 = vst [vmem:[#allocation5_spill] sm:$0xff] %v3610_v14  ;;  %1735 = vmatprep.mubr.bf16.mxu1 %v3610_v14  ;;  %v258_v57 = vshll.u32 %v3636_v48, 16  ;;  %v251_v2 = vrot.slane %v249_v53, 4  ;;  %v268_v4 = vshll.u32 %v3644_v52, 16  ;;  %v556_v29 = vshll.u32 %v187_v10, 16 }
  0x2c   : > { %v231_v25 = vor.u32 %v230_v17, %v227_v16  ;;  %v520_v50 = vrot.slane %v519_v39, 4  ;;  %v254_v3 = vrot.slane %v252_v54, 5  ;;  %v3289_v16 = vld [vmem:[%s4901_s1 + $0x130] sm:$0xff]   ;;  %v3686_v31 = vrot.slane %v637_v42, 4  ;;  %v3288_v39 = vld [vmem:[%s4901_s1 + $0x98] sm:$0xff]  }
  0x2d   : > { %2689 = vmatpush3.bf16.msra.mxu0 %v3267_v30  ;;  %3210 = vmatpush3.bf16.msra.mxu1 %v3267_v30  ;;  %v241_v30 = vor.u32 %v240_v20, %v236_v18  ;;  %v260_v8 = vrot.slane %v258_v57, 5  ;;  %v270_v19 = vrot.slane %v268_v4, 5  ;;  %v3706_v54 = vld [vmem:[%s3516_s24 + $0x24] sm:$0xf]  ;;  %v3297_v57 = vld [vmem:[%s4901_s1 + $0x168] sm:$0xff]  }
  0x2e   : > { %2690 = vmatprep.subr.bf16.mxu0 %v3268_v35  ;;  %3203 = vmatprep.subr.bf16.mxu1 %v3268_v35  ;;  %v232_v33 = vrot.slane %v231_v25, 4  ;;  %v528_v35 = vrot.slane %v526_v28, 4  ;;  %v188_v10 = vld [vmem:[%s3516_s24 + $0xb4] sm:$0xf] }
  0x2f   : > { %v242_v38 = vrot.slane %v241_v30, 4  ;;  %v3286_v30 = vld [vmem:[%s4901_s1 + $0xd8] sm:$0xff]  }
  0x30   : > { %v237_v41 = vsel %vm3560_vm2, %v232_v33, %v236_v18  ;;  %v529_v43 = vor.u32 %v528_v35, %v524_v34  ;;  %v255_v18 = vor.u32 %v254_v3, %v251_v2  ;;  %v276_v2 = vshll.u32 %v3706_v54, 16 }
  0x31   : > { %2691 = vmatpush3.bf16.msra.mxu0 %v3269_v49  ;;  %3211 = vmatpush3.bf16.msra.mxu1 %v3269_v49  ;;  %v247_v49 = vsel %vm3560_vm2, %v242_v38, %v246_v21  ;;  %v3283_v21 = vld [vmem:[%s4901_s1 + $0xa0] sm:$0xff]   ;;  %v558_v38 = vrot.slane %v556_v29, 5 }
  0x32   : > { %2788 = vmatprep.subr.bf16.mxu1 %v3272_v56  ;;  %2900 = vmatprep.subr.bf16.mxu0 %v3275_v59  ;;  %v3648_v55 = vcombine.low %v237_v41, %v247_v49  ;;  %v530_v56 = vrot.slane %v529_v43, 4  ;;  %v3653_v59 = vld [vmem:[%s3516_s24 + $0xa8] sm:$0xf]  ;;  %v256_v26 = vrot.slane %v255_v18, 4  ;;  %v3698_v43 = vcombine.low %v3633_v47, %v3636_v48 }
  0x33   : > { %v540_v20 = vshll.u32 %v3653_v59, 16 }
  0x34   : > { %1640 = vmatmul.mubr.bf16.vlgmr.msra.gmra.mxu0 %v2544_v58  ;;  %1736 = vmatmul.mubr.bf16.vlgmr.msra.gmra.mxu1 %v3601_v5  ;;  %v262_v58 = vshrl.u32 %v3636_v48, 16  ;;  %v535_v7 = vsel %vm3560_vm2, %v530_v56, %v534_v40  ;;  %v261_v35 = vsel %vm3560_vm2, %v256_v26, %v260_v8  ;;  %4923 = vst [vmem:[#allocation7_spill] sm:$0xff] %v3698_v43  ;;  %v3709_v56 = vld [vmem:[%s3516_s24 + $0x28] sm:$0xf] }
  0x35   : > { %2789 = vmatpush3.bf16.msra.mxu1 %v3273_v63  ;;  %2901 = vmatpush3.bf16.msra.mxu0 %v3277_v15  ;;  %v525_v63 = vsel %vm3560_vm2, %v520_v50, %v524_v34  ;;  %v537_v15 = vshrl.u32 %v3653_v59, 16  ;;  %v542_v28 = vrot.slane %v540_v20, 5  ;;  %v282_v3 = vshll.u32 %v3709_v56, 16 }
  0x36   : > { %2790 = vmatprep.subr.bf16.mxu1 %v3274_v6  ;;  %v186_v6 = vld [vmem:[%s3516_s24 + $0xac] sm:$0xf]  ;;  %1647 = vmatprep.mubr.bf16.mxu0 %v3648_v55  ;;  %v264_v9 = vrot.slane %v262_v58, 4  ;;  %v3673_v17 = vcombine.low %v525_v63, %v535_v7  ;;  %v278_v20 = vrot.slane %v276_v2, 5  ;;  %v3775_v13 = vcombine.low %v3706_v54, %v3709_v56 }
  0x37   : > { %2902 = vmatprep.subr.bf16.mxu0 %v3287_v62  ;;  %v539_v23 = vrot.slane %v537_v15, 4  ;;  %v550_v25 = vshrl.u32 %v186_v6, 16  ;;  %v3291_v62 = vld [vmem:[%s4901_s1 + $0x90] sm:$0xff]   ;;  %v3721_v63 = vld [vmem:[%s3516_s24 + $0x2c] sm:$0x1]  ;;  %v3730_v7 = vcombine.low %v3653_v59, %v186_v6 }
  0x38   : > { %4922 = vst [vmem:[#allocation6_spill] sm:$0xff] %v3673_v17  ;;  %v265_v22 = vor.u32 %v264_v9, %v260_v8  ;;  %1743 = vmatprep.mubr.bf16.mxu1 %v3673_v17  ;;  %v286_v8 = vshrl.u32 %v3709_v56, 16  ;;  %v292_v9 = vshll.u32 %v3721_v63, 16  ;;  %v189_v15 = vld [vmem:[%s3516_s24 + $0xb8] sm:$0xf]  ;;  %v3299_v59 = vld [vmem:[%s4901_s1 + $0x128] sm:$0xff]  }
  0x39   : > { %2791 = vmatpush3.bf16.msra.mxu1 %v3276_v24  ;;  %v546_v24 = vshll.u32 %v186_v6, 16  ;;  %2903 = vmatpush3.bf16.msra.mxu0 %v3289_v16  ;;  %v552_v34 = vrot.slane %v550_v25, 4  ;;  %v3294_v16 = vld [vmem:[%s4901_s1 + $0xc8] sm:$0xff]   ;;  %v564_v25 = vshll.u32 %v188_v10, 16  ;;  %v574_v29 = vshrl.u32 %v189_v15, 16  ;;  %4927 = vst [vmem:[#allocation9_spill] sm:$0xff] %v3775_v13 }
  0x3a   : > { %2792 = vmatprep.subr.bf16.mxu1 %v3280_v37  ;;  %v266_v32 = vrot.slane %v265_v22, 4  ;;  %v543_v37 = vor.u32 %v542_v28, %v539_v23  ;;  %v190_v22 = vld [vmem:[%s3516_s24 + $0xbc] sm:$0x1]  ;;  %2904 = vmatprep.subr.bf16.mxu0 %v3297_v57  ;;  %v288_v6 = vrot.slane %v286_v8, 4  ;;  %v294_v23 = vrot.slane %v292_v9, 5 }
  0x3b   : > { %v548_v33 = vrot.slane %v546_v24, 5  ;;  %v561_v24 = vshrl.u32 %v188_v10, 16  ;;  %v570_v28 = vshll.u32 %v189_v15, 16  ;;  %v3764_v57 = vsel %vm3751_vm5, %v3686_v31, %v640_v46  ;;  %v3301_v46 = vld [vmem:[%s4901_s1 + $0x1f8] sm:$0xff]   ;;  %v3784_v9 = vld [vmem:[%s3516_s24 + $0x30] sm:$0xf] }
  0x3c   : > { %1648 = vmatmul.mubr.bf16.gmra.mxu0 %v3628_v44  ;;  %1744 = vmatmul.mubr.bf16.gmra.mxu1 %v3630_v45  ;;  %v271_v40 = vsel %vm3560_vm2, %v266_v32, %v270_v19  ;;  %v544_v50 = vrot.slane %v543_v37, 4  ;;  %v3295_v32 = vld [vmem:[%s4901_s1 + $0x88] sm:$0xff]   ;;  %v566_v37 = vrot.slane %v564_v25, 5  ;;  %v2527_v31 = vrot.slane %v3582_v60, 9  ;;  %v3308_v60 = vld [vmem:[%s4901_s1 + $0x1b0] sm:$0xff]  }
  0x3d   : > { %2793 = vmatpush3.bf16.msra.mxu1 %v3281_v51  ;;  %v553_v41 = vor.u32 %v552_v34, %v548_v33  ;;  %v3700_v49 = vcombine.low %v261_v35, %v271_v40  ;;  %v3290_v51 = vld [vmem:[%s4901_s1 + $0xd0] sm:$0xff]   ;;  %2905 = vmatpush3.bf16.msra.mxu0 %v3299_v59  ;;  %v563_v35 = vrot.slane %v561_v24, 4  ;;  %v576_v40 = vrot.slane %v574_v29, 4 }
  0x3e   : > { %2794 = vmatprep.subr.bf16.mxu1 %v3282_v1  ;;  %v549_v58 = vsel %vm3560_vm2, %v544_v50, %v548_v33  ;;  %v273_v1 = vshrl.u32 %v3706_v54, 16  ;;  %v297_v59 = vshrl.u32 %v3784_v9, 16  ;;  %2906 = vmatprep.subr.bf16.mxu0 %v3304_v11 }
  0x3f   : > { %v554_v53 = vrot.slane %v553_v41, 4  ;;  %1655 = vmatprep.mubr.bf16.mxu0 %v3700_v49  ;;  %v3296_v41 = vld [vmem:[%s4901_s1 + $0xc0] sm:$0xff]  }
  0x40   : > { %v275_v19 = vrot.slane %v273_v1, 4  ;;  %v3298_v1 = vld [vmem:[%s4901_s1 + $0x80] sm:$0xff]  }
  0x41   : > { %2795 = vmatpush3.bf16.msra.mxu1 %v3283_v21  ;;  %v559_v4 = vsel %vm3560_vm2, %v554_v53, %v558_v38  ;;  %v284_v21 = vrot.slane %v282_v3, 5 }
  0x42   : > { %2796 = vmatprep.subr.bf16.mxu1 %v3286_v30  ;;  %v3739_v18 = vcombine.low %v549_v58, %v559_v4  ;;  %v279_v26 = vor.u32 %v278_v20, %v275_v19  ;;  %v580_v30 = vshll.u32 %v190_v22, 16  ;;  %v3795_v19 = vsel %vm3751_vm5, %v2526_v27, %v637_v42  ;;  %v3801_v22 = vld [vmem:[%s3516_s24 + $0x38] sm:$0x1] }
  0x43   : > { %v289_v34 = vor.u32 %v288_v6, %v284_v21  ;;  %v644_v20 = vrot.slane %v3585_v61, 5  ;;  %v300_v6 = vshll.u32 %v3784_v9, 16  ;;  %v3812_v42 = vcombine.low %v188_v10, %v189_v15 }
  0x44   : > { %1656 = vmatmul.mubr.bf16.gmra.mxu0 %v3698_v43  ;;  %4924 = vst [vmem:[#allocation8_spill] sm:$0xff] %v3739_v18  ;;  %1751 = vmatprep.mubr.bf16.mxu1 %v3739_v18  ;;  %v280_v38 = vrot.slane %v279_v26, 4  ;;  %v582_v53 = vrot.slane %v580_v30, 5  ;;  %v316_v24 = vshll.u32 %v3801_v22, 16  ;;  %v299_v26 = vrot.slane %v297_v59, 4  ;;  %v3305_v30 = vld [vmem:[%s4901_s1 + $0x120] sm:$0xff]  }
  0x45   : > { %2797 = vmatpush3.bf16.msra.mxu1 %v3288_v39  ;;  %v572_v39 = vrot.slane %v570_v28, 5  ;;  %v290_v50 = vrot.slane %v289_v34, 4  ;;  %v302_v28 = vrot.slane %v300_v6, 5  ;;  %2907 = vmatpush3.bf16.msra.mxu0 %v3305_v30  ;;  %v646_v59 = vrot.slane %v644_v20, 4 }
  0x46   : > { %2798 = vmatprep.subr.bf16.mxu1 %v3290_v51  ;;  %1752 = vmatmul.mubr.bf16.gmra.mxu1 %v3730_v7  ;;  %v567_v51 = vor.u32 %v566_v37, %v563_v35  ;;  %v285_v58 = vsel %vm3560_vm2, %v280_v38, %v284_v21  ;;  %v318_v15 = vrot.slane %v316_v24, 5  ;;  %v2576_v35 = vcombine.low %v3795_v19, %v3764_v57  ;;  %v3829_v37 = vld [vmem:[%s3516_s24 + $0x40] sm:$0xf]  ;;  %v3832_v38 = vld [vmem:[%s3516_s24 + $0x44] sm:$0x1] }
  0x47   : > { %v295_v2 = vsel %vm3560_vm2, %v290_v50, %v294_v23  ;;  %v303_v34 = vor.u32 %v302_v28, %v299_v26  ;;  %v330_v50 = vshll.u32 %v3829_v37, 16  ;;  %v647_v6 = vrot.slane %v3593_v0, 5  ;;  %v3862_v24 = vld [vmem:[%s3516_s24 + $0x50] sm:$0x1] }
  0x48   : > { %v568_v3 = vrot.slane %v567_v51, 4  ;;  %v3781_v4 = vcombine.low %v285_v58, %v295_v2  ;;  %v334_v51 = vshrl.u32 %v3829_v37, 16  ;;  %v364_v61 = vshll.u32 %v3862_v24, 16 }
  0x49   : > { %2799 = vmatpush3.bf16.msra.mxu1 %v3291_v62  ;;  %v577_v62 = vor.u32 %v576_v40, %v572_v39  ;;  %v304_v57 = vrot.slane %v303_v34, 4 }
  0x4a   : > { %2800 = vmatprep.subr.bf16.mxu1 %v3294_v16  ;;  %v3787_v16 = vld [vmem:[%s3516_s24 + $0x34] sm:$0xf]  ;;  %v573_v21 = vsel %vm3560_vm2, %v568_v3, %v572_v39  ;;  %1663 = vmatprep.mubr.bf16.mxu0 %v3781_v4  ;;  %v332_v3 = vrot.slane %v330_v50, 5 }
  0x4b   : > { %v578_v8 = vrot.slane %v577_v62, 4  ;;  %v306_v12 = vshll.u32 %v3787_v16, 16  ;;  %v310_v23 = vshrl.u32 %v3787_v16, 16  ;;  %v3843_v58 = vcombine.low %v3784_v9, %v3787_v16 }
  0x4c   : > { %1664 = vmatmul.mubr.bf16.gmra.mxu0 %v3775_v13 }
  0x4d   : > { %2801 = vmatpush3.bf16.msra.mxu1 %v3295_v32  ;;  %v583_v27 = vsel %vm3560_vm2, %v578_v8, %v582_v53  ;;  %v308_v29 = vrot.slane %v306_v12, 5  ;;  %v312_v10 = vrot.slane %v310_v23, 4  ;;  %v3823_v32 = vld [vmem:[%s3516_s24 + $0x3c] sm:$0xf]  ;;  %v340_v53 = vshll.u32 %v3832_v38, 16  ;;  %4929 = vst [vmem:[#allocation11_spill] sm:$0xff] %v3843_v58 }
  0x4e   : > { %2802 = vmatprep.subr.bf16.mxu1 %v3296_v41  ;;  %v3816_v25 = vcombine.low %v573_v21, %v583_v27  ;;  %v321_v39 = vshrl.u32 %v3823_v32, 16  ;;  %v324_v40 = vshll.u32 %v3823_v32, 16  ;;  %v3302_v21 = vld [vmem:[%s4901_s1 + $0x1b8] sm:$0xff]   ;;  %v3854_v12 = vld [vmem:[%s3516_s24 + $0x48] sm:$0xf] }
  0x4f   : > { %v313_v41 = vor.u32 %v312_v10, %v308_v29  ;;  %v342_v8 = vrot.slane %v340_v53, 5  ;;  %v309_v19 = vsel %vm3560_vm2, %v304_v57, %v308_v29  ;;  %v3859_v23 = vld [vmem:[%s3516_s24 + $0x4c] sm:$0xf]  ;;  %v345_v26 = vshrl.u32 %v3854_v12, 16  ;;  %v3307_v29 = vld [vmem:[%s4901_s1 + $0x1f0] sm:$0xff]  }
  0x50   : > { %4928 = vst [vmem:[#allocation10_spill] sm:$0xff] %v3816_v25  ;;  %1759 = vmatprep.mubr.bf16.mxu1 %v3816_v25  ;;  %v323_v62 = vrot.slane %v321_v39, 4  ;;  %v348_v28 = vshll.u32 %v3854_v12, 16  ;;  %v354_v10 = vshll.u32 %v3859_v23, 16  ;;  %v358_v53 = vshrl.u32 %v3859_v23, 16 }
  0x51   : > { %2803 = vmatpush3.bf16.msra.mxu1 %v3298_v1  ;;  %v326_v1 = vrot.slane %v324_v40, 5  ;;  %v314_v2 = vrot.slane %v313_v41, 4  ;;  %v347_v39 = vrot.slane %v345_v26, 4  ;;  %v3309_v41 = vld [vmem:[%s4901_s1 + $0x158] sm:$0xff]   ;;  %v648_v57 = vsel %vm3751_vm5, %v646_v59, %v647_v6 }
  0x52   : > { %3012 = vmatprep.subr.bf16.mxu1 %v3301_v46  ;;  %1760 = vmatmul.mubr.bf16.gmra.mxu1 %v3812_v42  ;;  %v336_v46 = vrot.slane %v334_v51, 4  ;;  %v350_v40 = vrot.slane %v348_v28, 5  ;;  %v356_v51 = vrot.slane %v354_v10, 5  ;;  %v3915_v59 = vcombine.low %v3823_v32, %v3829_v37  ;;  %v3315_v10 = vld [vmem:[%s4901_s1 + $0x110] sm:$0xff]   ;;  %v4034_v25 = vld [vmem:[%s3516_s24 + $0x78] sm:$0xf] }
  0x53   : > { %1800 = vmatprep.mubr.bf16.mxu1 %v3628_v44  ;;  %v327_v44 = vor.u32 %v326_v1, %v323_v62  ;;  %v319_v11 = vsel %vm3560_vm2, %v314_v2, %v318_v15  ;;  %v645_v15 = vsel %vm3751_vm5, %v2527_v31, %v644_v20  ;;  %v3310_v31 = vld [vmem:[%s4901_s1 + $0x118] sm:$0xff]   ;;  %v2528_v1 = vrot.slane %v3633_v47, 9  ;;  %v3313_v2 = vld [vmem:[%s4901_s1 + $0x150] sm:$0xff]   ;;  %2908 = vmatprep.subr.bf16.mxu0 %v3309_v41  ;;  %v3936_v41 = vld [vmem:[%s3516_s24 + $0x60] sm:$0xf] }
  0x54   : > { %v337_v27 = vor.u32 %v336_v46, %v332_v3  ;;  %v3869_v30 = vcombine.low %v309_v19, %v319_v11  ;;  %v351_v62 = vor.u32 %v350_v40, %v347_v39  ;;  %v366_v46 = vrot.slane %v364_v61, 5  ;;  %v3314_v19 = vld [vmem:[%s4901_s1 + $0x1e8] sm:$0xff]   ;;  %4930 = vst [vmem:[#allocation12_spill] sm:$0xff] %v3915_v59  ;;  %2909 = vmatpush3.bf16.msra.mxu0 %v3310_v31 }
  0x55   : > { %v328_v0 = vrot.slane %v327_v44, 4  ;;  %v654_v44 = vrot.slane %v3644_v52, 5  ;;  %v3924_v26 = vcombine.low %v645_v15, %v648_v57  ;;  %2910 = vmatprep.subr.bf16.mxu0 %v3313_v2  ;;  %v444_v14 = vshll.u32 %v4034_v25, 16 }
  0x56   : > { %v338_v34 = vrot.slane %v337_v27, 4  ;;  %1671 = vmatprep.mubr.bf16.mxu0 %v3869_v30  ;;  %v352_v47 = vrot.slane %v351_v62, 4  ;;  %v3921_v27 = vld [vmem:[%s3516_s24 + $0x5c] sm:$0x1] }
  0x57   : > { %v333_v50 = vsel %vm3560_vm2, %v328_v0, %v332_v3  ;;  %1672 = vmatmul.mubr.bf16.gmra.mxu0 %v3843_v58  ;;  %v388_v40 = vshll.u32 %v3921_v27, 16 }
  0x58   : > { %v343_v20 = vsel %vm3560_vm2, %v338_v34, %v342_v8  ;;  %v651_v8 = vrot.slane %v3636_v48, 5  ;;  %v3918_v48 = vld [vmem:[%s3516_s24 + $0x58] sm:$0xf]  ;;  %v357_v34 = vsel %vm3560_vm2, %v352_v47, %v356_v51  ;;  %2911 = vmatpush3.bf16.msra.mxu0 %v3315_v10 }
  0x59   : > { %v3901_v3 = vcombine.low %v333_v50, %v343_v20  ;;  %v382_v0 = vshrl.u32 %v3918_v48, 16  ;;  %v3316_v50 = vld [vmem:[%s4901_s1 + $0x1a8] sm:$0xff]   ;;  %v3942_v20 = vld [vmem:[%s3516_s24 + $0x64] sm:$0xf]  ;;  %v390_v2 = vrot.slane %v388_v40, 5 }
  0x5a   : > { %1801 = vmatmul.mubr.bf16.vlgmr.msra.gmra.mxu1 %v2576_v35  ;;  %v360_v35 = vrot.slane %v358_v53, 4  ;;  %v653_v11 = vrot.slane %v651_v8, 4  ;;  %v652_v57 = vsel %vm3751_vm5, %v2528_v1, %v651_v8  ;;  %v3319_v1 = vld [vmem:[%s4901_s1 + $0x108] sm:$0xff]   ;;  %v658_v8 = vrot.slane %v3709_v56, 5  ;;  %v3321_v56 = vld [vmem:[%s4901_s1 + $0x1e0] sm:$0xff]  }
  0x5b   : > { %3013 = vmatpush3.bf16.msra.mxu1 %v3302_v21  ;;  %1808 = vmatprep.mubr.bf16.mxu1 %v3698_v43  ;;  %v3910_v21 = vld [vmem:[%s3516_s24 + $0x54] sm:$0xf]  ;;  %v384_v31 = vrot.slane %v382_v0, 4  ;;  %v661_v0 = vrot.slane %v3721_v63, 5 }
  0x5c   : > { %3014 = vmatprep.subr.bf16.mxu1 %v3307_v29  ;;  %1679 = vmatprep.mubr.bf16.mxu0 %v3901_v3  ;;  %v361_v6 = vor.u32 %v360_v35, %v356_v51  ;;  %v369_v52 = vshrl.u32 %v3910_v21, 16  ;;  %v372_v28 = vshll.u32 %v3910_v21, 16  ;;  %v378_v29 = vshll.u32 %v3918_v48, 16  ;;  %v3318_v51 = vld [vmem:[%s4901_s1 + $0x148] sm:$0xff]  }
  0x5d   : > { %v655_v62 = vsel %vm3751_vm5, %v653_v11, %v654_v44  ;;  %v3954_v35 = vld [vmem:[%s3516_s24 + $0x68] sm:$0x1]  ;;  %v393_v44 = vshrl.u32 %v3936_v41, 16  ;;  %v396_v11 = vshll.u32 %v3936_v41, 16  ;;  %2912 = vmatprep.subr.bf16.mxu0 %v3318_v51  ;;  %v3322_v51 = vld [vmem:[%s4901_s1 + $0x1a0] sm:$0xff]  }
  0x5e   : > { %v362_v39 = vrot.slane %v361_v6, 4  ;;  %v371_v15 = vrot.slane %v369_v52, 4  ;;  %v374_v53 = vrot.slane %v372_v28, 5  ;;  %v380_v61 = vrot.slane %v378_v29, 5  ;;  %2913 = vmatpush3.bf16.msra.mxu0 %v3319_v1  ;;  %v3325_v1 = vld [vmem:[%s4901_s1 + $0x100] sm:$0xff]  }
  0x5f   : > { %3015 = vmatpush3.bf16.msra.mxu1 %v3308_v60  ;;  %1680 = vmatmul.mubr.bf16.gmra.mxu0 %v3915_v59  ;;  %v402_v52 = vshll.u32 %v3942_v20, 16  ;;  %v395_v10 = vrot.slane %v393_v44, 4  ;;  %v3979_v40 = vcombine.low %v652_v57, %v655_v62 }
  0x60   : > { %3016 = vmatprep.subr.bf16.mxu1 %v3314_v19  ;;  %v367_v60 = vsel %vm3560_vm2, %v362_v39, %v366_v46  ;;  %v375_v47 = vor.u32 %v374_v53, %v371_v15  ;;  %v385_v6 = vor.u32 %v384_v31, %v380_v61  ;;  %v2529_v46 = vrot.slane %v3706_v54, 9  ;;  %v3987_v31 = vld [vmem:[%s3516_s24 + $0x6c] sm:$0xf] }
  0x61   : > { %v3958_v19 = vcombine.low %v357_v34, %v367_v60  ;;  %v3972_v54 = vcombine.low %v3854_v12, %v3859_v23  ;;  %v398_v34 = vrot.slane %v396_v11, 5  ;;  %v404_v39 = vrot.slane %v402_v52, 5 }
  0x62   : > { %1809 = vmatmul.mubr.bf16.gmra.mxu1 %v3924_v26  ;;  %v376_v28 = vrot.slane %v375_v47, 4  ;;  %v386_v29 = vrot.slane %v385_v6, 4  ;;  %v406_v15 = vshrl.u32 %v3942_v20, 16  ;;  %v412_v53 = vshll.u32 %v3954_v35, 16  ;;  %v3995_v6 = vld [vmem:[%s3516_s24 + $0x70] sm:$0xf] }
  0x63   : > { %1816 = vmatprep.mubr.bf16.mxu1 %v3775_v13  ;;  %3017 = vmatpush3.bf16.msra.mxu1 %v3316_v50  ;;  %v660_v47 = vrot.slane %v658_v8, 4  ;;  %v399_v57 = vor.u32 %v398_v34, %v395_v10  ;;  %v665_v10 = vrot.slane %v3787_v16, 5  ;;  %v420_v34 = vshll.u32 %v3987_v31, 16 }
  0x64   : > { %1687 = vmatprep.mubr.bf16.mxu0 %v3958_v19  ;;  %v381_v50 = vsel %vm3560_vm2, %v376_v28, %v380_v61  ;;  %v391_v63 = vsel %vm3560_vm2, %v386_v29, %v390_v2  ;;  %3018 = vmatprep.subr.bf16.mxu1 %v3321_v56  ;;  %v408_v62 = vrot.slane %v406_v15, 4  ;;  %v3324_v61 = vld [vmem:[%s4901_s1 + $0x140] sm:$0xff]   ;;  %v4001_v2 = vld [vmem:[%s3516_s24 + $0x74] sm:$0x1]  ;;  %v414_v52 = vrot.slane %v412_v53, 5  ;;  %v3326_v29 = vld [vmem:[%s4901_s1 + $0x1d8] sm:$0xff]  }
  0x65   : > { %v3992_v60 = vcombine.low %v381_v50, %v391_v63  ;;  %v400_v44 = vrot.slane %v399_v57, 4  ;;  %v417_v28 = vshrl.u32 %v3987_v31, 16  ;;  %2914 = vmatprep.subr.bf16.mxu0 %v3324_v61  ;;  %v659_v56 = vsel %vm3751_vm5, %v2529_v46, %v658_v8  ;;  %v3327_v50 = vld [vmem:[%s4901_s1 + $0x198] sm:$0xff]  }
  0x66   : > { %v409_v11 = vor.u32 %v408_v62, %v404_v39  ;;  %v426_v15 = vshll.u32 %v3995_v6, 16  ;;  %v662_v63 = vsel %vm3751_vm5, %v660_v47, %v661_v0  ;;  %v430_v16 = vshrl.u32 %v3995_v6, 16  ;;  %v4028_v8 = vld [vmem:[%s4901_s1 + $0x238] sm:$0xff]   ;;  %2915 = vmatpush3.bf16.msra.mxu0 %v3325_v1  ;;  %v3329_v0 = vld [vmem:[%s4901_s1 + $0x1d0] sm:$0xff]  }
  0x67   : > { %3019 = vmatpush3.bf16.msra.mxu1 %v3322_v51  ;;  %1688 = vmatmul.mubr.bf16.gmra.mxu0 %v3972_v54  ;;  %v419_v46 = vrot.slane %v417_v28, 4  ;;  %v405_v51 = vsel %vm3560_vm2, %v400_v44, %v404_v39  ;;  %v422_v57 = vrot.slane %v420_v34, 5  ;;  %v436_v61 = vshll.u32 %v4001_v2, 16  ;;  %v4047_v28 = vld [vmem:[%s3516_s24 + $0x7c] sm:$0xf]  ;;  %v3330_v1 = vld [vmem:[%s4901_s1 + $0x190] sm:$0xff]  }
  0x68   : > { %1695 = vmatprep.mubr.bf16.mxu0 %v3992_v60  ;;  %v410_v53 = vrot.slane %v409_v11, 4  ;;  %v428_v62 = vrot.slane %v426_v15, 5  ;;  %3020 = vmatprep.subr.bf16.mxu1 %v3326_v29  ;;  %v4041_v47 = vcombine.low %v3910_v21, %v3918_v48  ;;  %v2530_v44 = vrot.slane %v3784_v9, 9 }
  0x69   : > { %v432_v11 = vrot.slane %v430_v16, 4  ;;  %3148 = vmatprep.subr.bf16.mxu0 %v4028_v8  ;;  %v4053_v29 = vcombine.low %v659_v56, %v662_v63  ;;  %v667_v34 = vrot.slane %v665_v10, 4  ;;  %v668_v15 = vrot.slane %v3801_v22, 5  ;;  %v4059_v16 = vld [vmem:[%s3516_s24 + $0x80] sm:$0x1] }
  0x6a   : > { %1817 = vmatmul.mubr.bf16.gmra.mxu1 %v3979_v40  ;;  %v415_v39 = vsel %vm3560_vm2, %v410_v53, %v414_v52  ;;  %v423_v18 = vor.u32 %v422_v57, %v419_v46  ;;  %v438_v53 = vrot.slane %v436_v61, 5  ;;  %v450_v56 = vshll.u32 %v4047_v28, 16 }
  0x6b   : > { %1824 = vmatprep.mubr.bf16.mxu1 %v3843_v58  ;;  %3021 = vmatpush3.bf16.msra.mxu1 %v3327_v50  ;;  %v4056_v52 = vcombine.low %v405_v51, %v415_v39  ;;  %v433_v9 = vor.u32 %v432_v11, %v428_v62  ;;  %v441_v50 = vshrl.u32 %v4034_v25, 16  ;;  %v454_v63 = vshrl.u32 %v4047_v28, 16 }
  0x6c   : > { %3022 = vmatprep.subr.bf16.mxu1 %v3329_v0  ;;  %v424_v17 = vrot.slane %v423_v18, 4  ;;  %v666_v22 = vsel %vm3751_vm5, %v2530_v44, %v665_v10  ;;  %v672_v51 = vrot.slane %v3829_v37, 5  ;;  %v3332_v18 = vld [vmem:[%s4901_s1 + $0x1c8] sm:$0xff]   ;;  %v669_v61 = vsel %vm3751_vm5, %v667_v34, %v668_v15  ;;  %v4076_v44 = vld [vmem:[%s3516_s24 + $0x84] sm:$0xf] }
  0x6d   : > { %4931 = vst [vmem:[#allocation13_spill] sm:$0xff] %v4056_v52  ;;  %v434_v46 = vrot.slane %v433_v9, 4  ;;  %v443_v57 = vrot.slane %v441_v50, 4  ;;  %v446_v0 = vrot.slane %v444_v14, 5  ;;  %v452_v39 = vrot.slane %v450_v56, 5  ;;  %v3333_v37 = vld [vmem:[%s4901_s1 + $0x188] sm:$0xff]  }
  0x6e   : > { %v456_v10 = vrot.slane %v454_v63, 4  ;;  %v4085_v11 = vcombine.low %v3936_v41, %v3942_v20  ;;  %v4089_v34 = vld [vmem:[%s3516_s24 + $0x88] sm:$0xf]  ;;  %v429_v14 = vsel %vm3560_vm2, %v424_v17, %v428_v62  ;;  %v4095_v56 = vcombine.low %v666_v22, %v669_v61 }
  0x6f   : > { %3023 = vmatpush3.bf16.msra.mxu1 %v3330_v1  ;;  %1696 = vmatmul.mubr.bf16.gmra.mxu0 %v4041_v47  ;;  %v460_v1 = vshll.u32 %v4059_v16, 16  ;;  %v439_v15 = vsel %vm3560_vm2, %v434_v46, %v438_v53  ;;  %v447_v9 = vor.u32 %v446_v0, %v443_v57  ;;  %v2531_v63 = vrot.slane %v3823_v32, 9  ;;  %v4104_v46 = vld [vmem:[%s3516_s24 + $0x8c] sm:$0x1]  ;;  %v3335_v32 = vld [vmem:[%s4901_s1 + $0x1c0] sm:$0xff]  }
  0x70   : > { %1703 = vmatprep.mubr.bf16.mxu0 %v4056_v52  ;;  %v457_v50 = vor.u32 %v456_v10, %v452_v39  ;;  %3024 = vmatprep.subr.bf16.mxu1 %v3332_v18  ;;  %v675_v58 = vrot.slane %v3832_v38, 5  ;;  %v465_v52 = vshrl.u32 %v4076_v44, 16  ;;  %v468_v17 = vshll.u32 %v4076_v44, 16  ;;  %v3336_v10 = vld [vmem:[%s4901_s1 + $0x180] sm:$0xff]  }
  0x71   : > { %v448_v13 = vrot.slane %v447_v9, 4  ;;  %v462_v43 = vrot.slane %v460_v1, 5  ;;  %v4101_v62 = vcombine.low %v429_v14, %v439_v15  ;;  %v474_v22 = vshll.u32 %v4089_v34, 16 }
  0x72   : > { %1825 = vmatmul.mubr.bf16.gmra.mxu1 %v4053_v29  ;;  %v458_v53 = vrot.slane %v457_v50, 4  ;;  %v478_v57 = vshrl.u32 %v4089_v34, 16  ;;  %v467_v38 = vrot.slane %v465_v52, 4  ;;  %v470_v18 = vrot.slane %v468_v17, 5 }
  0x73   : > { %1832 = vmatprep.mubr.bf16.mxu1 %v3915_v59  ;;  %v674_v59 = vrot.slane %v672_v51, 4  ;;  %3025 = vmatpush3.bf16.msra.mxu1 %v3333_v37  ;;  %v476_v61 = vrot.slane %v474_v22, 5  ;;  %v673_v37 = vsel %vm3751_vm5, %v2531_v63, %v672_v51  ;;  %v679_v1 = vrot.slane %v3859_v23, 5 }
  0x74   : > { %v480_v0 = vrot.slane %v478_v57, 4  ;;  %3026 = vmatprep.subr.bf16.mxu1 %v3335_v32  ;;  %v471_v14 = vor.u32 %v470_v18, %v467_v38  ;;  %v453_v15 = vsel %vm3560_vm2, %v448_v13, %v452_v39  ;;  %v463_v9 = vsel %vm3560_vm2, %v458_v53, %v462_v43 }
  0x75   : > { %v676_v52 = vsel %vm3751_vm5, %v674_v59, %v675_v58  ;;  %v484_v17 = vshll.u32 %v4104_v46, 16  ;;  %v4130_v22 = vcombine.low %v3987_v31, %v3995_v6  ;;  %v2532_v58 = vrot.slane %v3854_v12, 9 }
  0x76   : > { %v481_v50 = vor.u32 %v480_v0, %v476_v61  ;;  %v4132_v51 = vcombine.low %v673_v37, %v676_v52  ;;  %v682_v23 = vrot.slane %v3862_v24, 5  ;;  %v4136_v59 = vcombine.low %v453_v15, %v463_v9 }
  0x77   : > { %1704 = vmatmul.mubr.bf16.gmra.mxu0 %v4085_v11  ;;  %3027 = vmatpush3.bf16.msra.mxu1 %v3336_v10  ;;  %v681_v13 = vrot.slane %v679_v1, 4  ;;  %v472_v39 = vrot.slane %v471_v14, 4  ;;  %v486_v43 = vrot.slane %v484_v17, 5  ;;  %v680_v53 = vsel %vm3751_vm5, %v2532_v58, %v679_v1 }
  0x78   : > { %1711 = vmatprep.mubr.bf16.mxu0 %v4101_v62  ;;  %v482_v63 = vrot.slane %v481_v50, 4  ;;  %v686_v24 = vrot.slane %v3918_v48, 5  ;;  %v4153_v38 = vcombine.low %v4034_v25, %v4047_v28  ;;  %v2533_v0 = vrot.slane %v3910_v21, 9 }
  0x79   : > { %v683_v12 = vsel %vm3751_vm5, %v681_v13, %v682_v23  ;;  %v477_v57 = vsel %vm3560_vm2, %v472_v39, %v476_v61  ;;  %v689_v52 = vrot.slane %v3921_v27, 5  ;;  %v693_v21 = vrot.slane %v3942_v20, 5  ;;  %v3331_v13 = vld [vmem:[%s4901_s1 + $0x230] sm:$0xff]  }
  0x7a   : > { %1833 = vmatmul.mubr.bf16.gmra.mxu1 %v4095_v56  ;;  %v487_v32 = vsel %vm3560_vm2, %v482_v63, %v486_v43  ;;  %v4155_v18 = vcombine.low %v680_v53, %v683_v12  ;;  %v688_v37 = vrot.slane %v686_v24, 4  ;;  %v687_v48 = vsel %vm3751_vm5, %v2533_v0, %v686_v24  ;;  %v3339_v53 = vld [vmem:[%s4901_s1 + $0x218] sm:$0xff]   ;;  %v3344_v0 = vld [vmem:[%s3516_s24 + $0x94] sm:$0xf] }
  0x7b   : > { %1840 = vmatprep.mubr.bf16.mxu1 %v3972_v54  ;;  %v4158_v10 = vcombine.low %v477_v57, %v487_v32  ;;  %v4172_v1 = vcombine.low %v4076_v44, %v4089_v34  ;;  %v2534_v14 = vrot.slane %v3936_v41, 9  ;;  %v695_v15 = vrot.slane %v693_v21, 4 }
  0x7c   : > { %v690_v61 = vsel %vm3751_vm5, %v688_v37, %v689_v52  ;;  %v696_v9 = vrot.slane %v3954_v35, 5  ;;  %v700_v17 = vrot.slane %v3995_v6, 5  ;;  %v2535_v35 = vrot.slane %v3987_v31, 9  ;;  %v3341_v52 = vld [vmem:[%s4901_s1 + $0x208] sm:$0xff]  }
  0x7d   : > { %v4174_v27 = vcombine.low %v687_v48, %v690_v61  ;;  %v694_v20 = vsel %vm3751_vm5, %v2534_v14, %v693_v21  ;;  %v703_v23 = vrot.slane %v4001_v2, 5  ;;  %v707_v6 = vrot.slane %v4047_v28, 5  ;;  %v3334_v2 = vld [vmem:[%s4901_s1 + $0x228] sm:$0xff]   ;;  %v3337_v28 = vld [vmem:[%s4901_s1 + $0x220] sm:$0xff]   ;;  %v3345_v61 = vld [vmem:[%s3516_s24 + $0x90] sm:$0xf] }
  0x7e   : > { %v697_v50 = vsel %vm3751_vm5, %v695_v15, %v696_v9  ;;  %v702_v58 = vrot.slane %v700_v17, 4  ;;  %v710_v63 = vrot.slane %v4059_v16, 5  ;;  %v714_v43 = vrot.slane %v4089_v34, 5  ;;  %v3340_v34 = vld [vmem:[%s4901_s1 + $0x210] sm:$0xff]   ;;  %v3346_v15 = vld [vmem:[%s3516_s24 + $0x98] sm:$0x1] }
  0x7f   : > { %1712 = vmatmul.mubr.bf16.gmra.mxu0 %v4130_v22  ;;  %v4187_v41 = vcombine.low %v694_v20, %v697_v50  ;;  %v709_v39 = vrot.slane %v707_v6, 4  ;;  %v2537_v24 = vrot.slane %v4076_v44, 9  ;;  %v717_v32 = vrot.slane %v4104_v46, 5  ;;  %v3342_v20 = vld [vmem:[%s4901_s1 + $0x200] sm:$0xff]  }
  0x80   : > { %1719 = vmatprep.mubr.bf16.mxu0 %v4136_v59  ;;  %v704_v31 = vsel %vm3751_vm5, %v702_v58, %v703_v23  ;;  %v716_v57 = vrot.slane %v714_v43, 4  ;;  %v721_v37 = vrot.slane %v3344_v0, 5  ;;  %v2538_v21 = vrot.slane %v3345_v61, 9  ;;  %v4288_v0 = vld [vmem:[%s3516_s24 + $0xc0] sm:$0xf] }
  0x81   : > { %v711_v16 = vsel %vm3751_vm5, %v709_v39, %v710_v63  ;;  %v715_v44 = vsel %vm3751_vm5, %v2537_v24, %v714_v43  ;;  %v724_v9 = vrot.slane %v3346_v15, 5  ;;  %v3350_v63 = vld [vmem:[%s3516_s24 + $0xac] sm:$0xf]  ;;  %v3352_v24 = vld [vmem:[%s3516_s24 + $0xb0] sm:$0x1] }
  0x82   : > { %1841 = vmatmul.mubr.bf16.gmra.mxu1 %v4132_v51  ;;  %v718_v46 = vsel %vm3751_vm5, %v716_v57, %v717_v32  ;;  %v723_v14 = vrot.slane %v721_v37, 4  ;;  %v722_v50 = vsel %vm3751_vm5, %v2538_v21, %v721_v37  ;;  %v738_v57 = vrot.slane %v3352_v24, 5  ;;  %v4291_v37 = vld [vmem:[%s3516_s24 + $0xc4] sm:$0xf]  ;;  %v3354_v21 = vld [vmem:[%s3516_s24 + $0xb4] sm:$0xf] }
  0x83   : > { %1848 = vmatprep.mubr.bf16.mxu1 %v4041_v47  ;;  %v4245_v48 = vcombine.low %v715_v44, %v718_v46  ;;  %v3353_v44 = vld [vmem:[%s3516_s24 + $0xb8] sm:$0xf]  ;;  %v4297_v61 = vcombine.low %v4288_v0, %v4291_v37 }
  0x84   : > { %v742_v46 = vrot.slane %v3353_v44, 5  ;;  %v761_v44 = vshrl.u32 %v4291_v37, 16 }
  0x86   : > { %v744_v15 = vrot.slane %v742_v46, 4 }
  0x87   : > { %1720 = vmatmul.mubr.bf16.gmra.mxu0 %v4153_v38 }
  0x88   : > { %1727 = vmatprep.mubr.bf16.mxu0 %v4158_v10 }
  0x8a   : > { %1849 = vmatmul.mubr.bf16.gmra.mxu1 %v4155_v18 }
  0x8b   : > { %1856 = vmatprep.mubr.bf16.mxu1 %v4085_v11 }
  0x8f   : > { %1728 = vmatmul.mubr.bf16.gmra.mxu0 %v4172_v1 }
  0x90   : > { %1961 = vmatprep.mubr.bf16.mxu0 %v3924_v26  ;;  %v701_v26 = vsel %vm3751_vm5, %v2535_v35, %v700_v17  ;;  %v725_v17 = vsel %vm3751_vm5, %v723_v14, %v724_v9  ;;  %v3347_v35 = vld [vmem:[%s3516_s24 + $0xa0] sm:$0xf]  ;;  %v2541_v14 = vrot.slane %v3354_v21, 9  ;;  %v3355_v9 = vld [vmem:[%s3516_s24 + $0xbc] sm:$0x1] }
  0x91   : > { %v728_v58 = vrot.slane %v3347_v35, 5  ;;  %v4261_v23 = vcombine.low %v722_v50, %v725_v17 }
  0x92   : > { %1857 = vmatmul.mubr.bf16.gmra.mxu1 %v4174_v27  ;;  %v743_v50 = vsel %vm3751_vm5, %v2541_v14, %v742_v46  ;;  %v757_v46 = vshll.u32 %v4291_v37, 16  ;;  %v776_v14 = vrot.slane %v4291_v37, 5  ;;  %v4939_v37 = vld [vmem:[#allocation8_spill] sm:$0xff] }
  0x93   : > { %1864 = vmatprep.mubr.bf16.mxu1 %v4130_v22 }
  0x97   : > { %1962 = vmatmul.mubr.bf16.vlgmr.msra.gmra.mxu0 %v3648_v55  ;;  %v4207_v55 = vcombine.low %v701_v26, %v704_v31  ;;  %v730_v31 = vrot.slane %v728_v58, 4 }
  0x98   : > { %3149 = vmatpush3.bf16.msra.mxu0 %v4028_v8  ;;  %1969 = vmatprep.mubr.bf16.mxu0 %v3979_v40  ;;  %v2536_v8 = vrot.slane %v4034_v25, 9 }
  0x99   : > { %3150 = vmatprep.subr.bf16.mxu0 %v3331_v13 }
  0x9a   : > { %1865 = vmatmul.mubr.bf16.gmra.mxu1 %v4187_v41  ;;  %v708_v25 = vsel %vm3751_vm5, %v2536_v8, %v707_v6  ;;  %v3349_v6 = vld [vmem:[%s3516_s24 + $0xa4] sm:$0x1] }
  0x9b   : > { %1872 = vmatprep.mubr.bf16.mxu1 %v4153_v38  ;;  %v4226_v12 = vcombine.low %v708_v25, %v711_v16  ;;  %v3351_v16 = vld [vmem:[%s3516_s24 + $0xa8] sm:$0xf] }
  0x9c   : > { %3151 = vmatpush3.bf16.msra.mxu0 %v3331_v13  ;;  %v3348_v13 = vld [vmem:[%s3516_s24 + $0x9c] sm:$0xf]  ;;  %v2540_v43 = vrot.slane %v3351_v16, 9 }
  0x9d   : > { %3152 = vmatprep.subr.bf16.mxu0 %v3334_v2  ;;  %v2539_v26 = vrot.slane %v3348_v13, 9  ;;  %v4933_v13 = vld [vmem:[#allocation7_spill] sm:$0xff] }
  0x9f   : > { %1970 = vmatmul.mubr.bf16.gmra.mxu0 %v3700_v49  ;;  %v729_v8 = vsel %vm3751_vm5, %v2539_v26, %v728_v58  ;;  %v4932_v58 = vld [vmem:[#allocation13_spill] sm:$0xff] }
  0xa0   : > { %1977 = vmatprep.mubr.bf16.mxu0 %v4053_v29  ;;  %3153 = vmatpush3.bf16.msra.mxu0 %v3334_v2  ;;  %v731_v2 = vrot.slane %v3349_v6, 5  ;;  %v4934_v26 = vld [vmem:[#allocation9_spill] sm:$0xff]  ;;  %v4937_v6 = vld [vmem:[#allocation12_spill] sm:$0xff] }
  0xa1   : > { %3154 = vmatprep.subr.bf16.mxu0 %v3337_v28 }
  0xa2   : > { %1873 = vmatmul.mubr.bf16.gmra.mxu1 %v4207_v55  ;;  %v732_v39 = vsel %vm3751_vm5, %v730_v31, %v731_v2  ;;  %v4935_v31 = vld [vmem:[#allocation11_spill] sm:$0xff] }
  0xa3   : > { %1880 = vmatprep.mubr.bf16.mxu1 %v4172_v1  ;;  %v4274_v25 = vcombine.low %v729_v8, %v732_v39 }
  0xa4   : > { %3155 = vmatpush3.bf16.msra.mxu0 %v3337_v28  ;;  %v735_v28 = vrot.slane %v3350_v63, 5 }
  0xa5   : > { %3156 = vmatprep.subr.bf16.mxu0 %v3339_v53 }
  0xa6   : > { %v736_v32 = vsel %vm3751_vm5, %v2540_v43, %v735_v28 }
  0xa7   : > { %1978 = vmatmul.mubr.bf16.gmra.mxu0 %v3781_v4 }
  0xa8   : > { %1985 = vmatprep.mubr.bf16.mxu0 %v4095_v56  ;;  %3157 = vmatpush3.bf16.msra.mxu0 %v3339_v53  ;;  %v737_v53 = vrot.slane %v735_v28, 4 }
  0xa9   : > { %3158 = vmatprep.subr.bf16.mxu0 %v3340_v34 }
  0xaa   : > { %1881 = vmatmul.mubr.bf16.gmra.mxu1 %v4226_v12 }
  0xab   : > { %1888 = vmatprep.mubr.bf16.mxu1 %v3601_v5 }
  0xac   : > { %3159 = vmatpush3.bf16.msra.mxu0 %v3340_v34  ;;  %v739_v34 = vsel %vm3751_vm5, %v737_v53, %v738_v57  ;;  %v4938_v57 = vld [vmem:[#allocation6_spill] sm:$0xff] }
  0xad   : > { %3160 = vmatprep.subr.bf16.mxu0 %v3341_v52 }
  0xaf   : > { %1986 = vmatmul.mubr.bf16.gmra.mxu0 %v3869_v30 }
  0xb0   : > { %1993 = vmatprep.mubr.bf16.mxu0 %v4132_v51  ;;  %3161 = vmatpush3.bf16.msra.mxu0 %v3341_v52  ;;  %v4293_v52 = vcombine.low %v736_v32, %v739_v34  ;;  %v748_v32 = vshrl.u32 %v4288_v0, 16  ;;  %v751_v34 = vshll.u32 %v4288_v0, 16 }
  0xb1   : > { %3162 = vmatprep.subr.bf16.mxu0 %v3342_v20 }
  0xb2   : > { %1889 = vmatmul.mubr.bf16.gmra.mxu1 %v4245_v48 }
  0xb3   : > { %1896 = vmatprep.mubr.bf16.mxu1 %v3630_v45 }
  0xb4   : > { %3163 = vmatpush3.bf16.msra.mxu0 %v3342_v20  ;;  %v745_v20 = vrot.slane %v3355_v9, 5 }
  0xb6   : > { %v746_v17 = vsel %vm3751_vm5, %v744_v15, %v745_v20 }
  0xb7   : > { %1994 = vmatmul.mubr.bf16.gmra.mxu0 %v3901_v3  ;;  %v4309_v35 = vcombine.low %v743_v50, %v746_v17  ;;  %v750_v17 = vrot.slane %v748_v32, 4 }
  0xb8   : > { %2001 = vmatprep.mubr.bf16.mxu0 %v4155_v18 }
  0xba   : > { %1897 = vmatmul.mubr.bf16.gmra.mxu1 %v4261_v23 }
  0xbb   : > { %1904 = vmatprep.mubr.bf16.mxu1 %v3730_v7 }
  0xbf   : > { %2002 = vmatmul.mubr.bf16.gmra.mxu0 %v3958_v19 }
  0xc0   : > { %2009 = vmatprep.mubr.bf16.mxu0 %v4174_v27 }
  0xc2   : > { %1905 = vmatmul.mubr.bf16.gmra.mxu1 %v4274_v25 }
  0xc3   : > { %1912 = vmatprep.mubr.bf16.mxu1 %v3812_v42 }
  0xc7   : > { %2010 = vmatmul.mubr.bf16.gmra.mxu0 %v3992_v60 }
  0xc8   : > { %2017 = vmatprep.mubr.bf16.mxu0 %v4187_v41 }
  0xca   : > { %1913 = vmatmul.mubr.bf16.gmra.mxu1 %v4293_v52 }
  0xcb   : > { %1920 = vmatprep.mubr.bf16.mxu1 %v4297_v61 }
  0xcf   : > { %2018 = vmatmul.mubr.bf16.gmra.mxu0 %v4932_v58 }
  0xd0   : > { %2025 = vmatprep.mubr.bf16.mxu0 %v4207_v55 }
  0xd2   : > { %1921 = vmatmul.mubr.bf16.gmra.mxu1 %v4309_v35 }
  0xd3   : > { %2122 = vmatprep.mubr.bf16.mxu1 %v3700_v49  ;;  %v4936_v49 = vld [vmem:[#allocation5_spill] sm:$0xff] }
  0xd7   : > { %2026 = vmatmul.mubr.bf16.gmra.mxu0 %v4101_v62 }
  0xd8   : > { %2033 = vmatprep.mubr.bf16.mxu0 %v4226_v12 }
  0xda   : > { %2123 = vmatmul.mubr.bf16.vlgmr.msra.gmra.mxu1 %v4933_v13  ;;  %v753_v13 = vrot.slane %v751_v34, 5 }
  0xdb   : > { %2130 = vmatprep.mubr.bf16.mxu1 %v3781_v4 }
  0xdf   : > { %2034 = vmatmul.mubr.bf16.gmra.mxu0 %v4136_v59 }
  0xe0   : > { %2041 = vmatprep.mubr.bf16.mxu0 %v4245_v48 }
  0xe2   : > { %2131 = vmatmul.mubr.bf16.gmra.mxu1 %v4934_v26  ;;  %v759_v26 = vrot.slane %v757_v46, 5 }
  0xe3   : > { %2138 = vmatprep.mubr.bf16.mxu1 %v3869_v30 }
  0xe7   : > { %2042 = vmatmul.mubr.bf16.gmra.mxu0 %v4158_v10 }
  0xe8   : > { %2049 = vmatprep.mubr.bf16.mxu0 %v4261_v23 }
  0xea   : > { %2139 = vmatmul.mubr.bf16.gmra.mxu1 %v4935_v31  ;;  %v763_v31 = vrot.slane %v761_v44, 4 }
  0xeb   : > { %2146 = vmatprep.mubr.bf16.mxu1 %v3901_v3 }
  0xef   : > { %2050 = vmatmul.mubr.bf16.gmra.mxu0 %v4936_v49 }
  0xf0   : > { %2057 = vmatprep.mubr.bf16.mxu0 %v4274_v25 }
  0xf2   : > { %2147 = vmatmul.mubr.bf16.gmra.mxu1 %v4937_v6 }
  0xf3   : > { %2154 = vmatprep.mubr.bf16.mxu1 %v3958_v19 }
  0xf4   : > { %v2692_v4 = vpop.f32.mrf.mxu0  ;;  %v2764_v2 = vpop.f32.mrf.mxu1 }
  0xf6   : > { %v2693_v8 = vpop.f32.mrf.mxu0  ;;  %v2765_v30 = vpop.f32.mrf.mxu1 }
  0xf7   : > { %v4331_v39 = vadd.f32 %v2693_v8, %v2692_v4  ;;  %v4333_v63 = vadd.f32 %v2765_v30, %v2764_v2  ;;  %2058 = vmatmul.mubr.bf16.gmra.mxu0 %v4938_v57  ;;  %v778_v2 = vrot.slane %v776_v14, 4 }
  0xf8   : > { %v2695_v28 = vpop.f32.mrf.mxu0  ;;  %v2767_v16 = vpop.f32.mrf.mxu1  ;;  %2065 = vmatprep.mubr.bf16.mxu0 %v4293_v52 }
  0xfa   : > { %v2696_v43 = vpop.f32.mrf.mxu0  ;;  %v2768_v3 = vpop.f32.mrf.mxu1  ;;  %2155 = vmatmul.mubr.bf16.gmra.mxu1 %v3972_v54  ;;  %v193_v54 = vld [vmem:[%s3516_s24 + $0xc8] sm:$0x1] }
  0xfb   : > { %v4335_v53 = vadd.f32 %v2696_v43, %v2695_v28  ;;  %v4337_v24 = vadd.f32 %v2768_v3, %v2767_v16  ;;  %2162 = vmatprep.mubr.bf16.mxu1 %v3992_v60  ;;  %v2542_v60 = vrot.slane %v4288_v0, 9  ;;  %v779_v8 = vrot.slane %v193_v54, 5 }
  0xfc   : > { %v2698_v19 = vpop.f32.mrf.mxu0  ;;  %v2770_v15 = vpop.f32.mrf.mxu1  ;;  %v754_v3 = vor.u32 %v753_v13, %v750_v17  ;;  %v767_v32 = vshll.u32 %v193_v54, 16 }
  0xfd   : > { %v777_v0 = vsel %vm3751_vm5, %v2542_v60, %v776_v14  ;;  %v780_v44 = vsel %vm3751_vm5, %v778_v2, %v779_v8 }
  0xfe   : > { %v2699_v21 = vpop.f32.mrf.mxu0  ;;  %v2771_v50 = vpop.f32.mrf.mxu1  ;;  %v769_v17 = vrot.slane %v767_v32, 5 }
  0xff   : > { %v4348_v9 = vadd.f32 %v2699_v21, %v2698_v19  ;;  %v4351_v6 = vadd.f32 %v2771_v50, %v2770_v15  ;;  %2066 = vmatmul.mubr.bf16.gmra.mxu0 %v4939_v37  ;;  %v764_v19 = vor.u32 %v763_v31, %v759_v26  ;;  %v4940_v31 = vld [vmem:[#allocation10_spill] sm:$0xff] }
 0x100   : > { %v2701_v20 = vpop.f32.mrf.mxu0  ;;  %v2773_v30 = vpop.f32.mrf.mxu1  ;;  %2073 = vmatprep.mubr.bf16.mxu0 %v4309_v35 }
 0x101   : > { %v765_v50 = vrot.slane %v764_v19, 4 }
 0x102   : > { %v2702_v4 = vpop.f32.mrf.mxu0  ;;  %2163 = vmatmul.mubr.bf16.gmra.mxu1 %v4041_v47  ;;  %v2774_v16 = vpop.f32.mrf.mxu1 }
 0x103   : > { %v4354_v28 = vadd.f32 %v2702_v4, %v2701_v20  ;;  %2170 = vmatprep.mubr.bf16.mxu1 %v4932_v58  ;;  %v4360_v34 = vadd.f32 %v2774_v16, %v2773_v30  ;;  %v4368_v20 = vcombine.low %v777_v0, %v780_v44  ;;  %v755_v58 = vrot.slane %v754_v3, 4 }
 0x104   : > { %v2704_v43 = vpop.f32.mrf.mxu0  ;;  %v770_v8 = vsel %vm3560_vm2, %v765_v50, %v769_v17 }
 0x105   : > { %v760_v2 = vsel %vm3560_vm2, %v755_v58, %v759_v26 }
 0x106   : > { %v2705_v46 = vpop.f32.mrf.mxu0  ;;  %v2776_v47 = vpop.f32.mrf.mxu1 }
 0x107   : > { %v4366_v21 = vadd.f32 %v2705_v46, %v2704_v43  ;;  %2074 = vmatmul.mubr.bf16.gmra.mxu0 %v4940_v31  ;;  %v4384_v43 = vcombine.low %v760_v2, %v770_v8 }
 0x108   : > { %v2707_v15 = vpop.f32.mrf.mxu0  ;;  %v2777_v13 = vpop.f32.mrf.mxu1  ;;  %2081 = vmatprep.mubr.bf16.mxu0 %v4368_v20 }
 0x109   : > { %v4372_v14 = vadd.f32 %v2777_v13, %v2776_v47 }
 0x10a   : > { %v2708_v54 = vpop.f32.mrf.mxu0  ;;  %2171 = vmatmul.mubr.bf16.gmra.mxu1 %v4085_v11  ;;  %v2779_v60 = vpop.f32.mrf.mxu1 }
 0x10b   : > { %v4374_v4 = vadd.f32 %v2708_v54, %v2707_v15  ;;  %2178 = vmatprep.mubr.bf16.mxu1 %v4101_v62 }
 0x10c   : > { %v2780_v30 = vpop.f32.mrf.mxu1  ;;  %v2710_v11 = vpop.f32.mrf.mxu0 }
 0x10d   : > { %v4382_v16 = vadd.f32 %v2780_v30, %v2779_v60 }
 0x10e   : > { %v2711_v3 = vpop.f32.mrf.mxu0 }
 0x10f   : > { %2082 = vmatmul.mubr.bf16.gmra.mxu0 %v4384_v43  ;;  %v4388_v32 = vadd.f32 %v2711_v3, %v2710_v11 }
 0x110   : > { %v2713_v62 = vpop.f32.mrf.mxu0  ;;  %3164 = vmatprep.mubr.bf16.mxu0 %v3979_v40 }
 0x112   : > { %v2782_v19 = vpop.f32.mrf.mxu1  ;;  %2179 = vmatmul.mubr.bf16.gmra.mxu1 %v4130_v22  ;;  %v2714_v44 = vpop.f32.mrf.mxu0 }
 0x113   : > { %2186 = vmatprep.mubr.bf16.mxu1 %v4136_v59  ;;  %v4394_v47 = vadd.f32 %v2714_v44, %v2713_v62 }
 0x114   : > { %v2783_v26 = vpop.f32.mrf.mxu1 }
 0x115   : > { %v4392_v0 = vadd.f32 %v2783_v26, %v2782_v19 }
 0x116   : > { %v2785_v46 = vpop.f32.mrf.mxu1 }
 0x117   : > { %v2716_v50 = vpop.f32.mrf.mxu0  ;;  %3165 = vmatmul.mubr.bf16.vlgmr.msra.gmra.mxu0 %v4053_v29 }
 0x118   : > { %v2786_v15 = vpop.f32.mrf.mxu1  ;;  %3168 = vmatprep.mubr.bf16.mxu0 %v4095_v56 }
 0x119   : > { %v4396_v58 = vadd.f32 %v2786_v15, %v2785_v46  ;;  %v2717_v40 = vpop.f32.mrf.mxu0 }
 0x11a   : > { %v2804_v17 = vpop.f32.mrf.mxu1  ;;  %2187 = vmatmul.mubr.bf16.gmra.mxu1 %v4153_v38  ;;  %v4402_v59 = vadd.f32 %v2717_v40, %v2716_v50 }
 0x11b   : > { %2194 = vmatprep.mubr.bf16.mxu1 %v4158_v10  ;;  %v2719_v54 = vpop.f32.mrf.mxu0 }
 0x11c   : > { %v2805_v22 = vpop.f32.mrf.mxu1 }
 0x11d   : > { %v2806_v13 = vadd.f32 %v2805_v22, %v2804_v17  ;;  %v2720_v8 = vpop.f32.mrf.mxu0 }
 0x11e   : > { %v2807_v60 = vpop.f32.mrf.mxu1  ;;  %v4407_v11 = vadd.f32 %v2720_v8, %v2719_v54 }
 0x11f   : > { %v4405_v2 = vadd.f32 %v2806_v13, %v4331_v39  ;;  %v2722_v29 = vpop.f32.mrf.mxu0  ;;  %3169 = vmatmul.mubr.bf16.gmra.mxu0 %v4132_v51 }
 0x120   : > { %v2808_v30 = vpop.f32.mrf.mxu1  ;;  %3172 = vmatprep.mubr.bf16.mxu0 %v4155_v18 }
 0x121   : > { %v2809_v38 = vadd.f32 %v2808_v30, %v2807_v60  ;;  %v2723_v10 = vpop.f32.mrf.mxu0  ;;  %v4438_v30 = vld [vmem:[%s3516_s24 + $0xcc] sm:$0xf] }
 0x122   : > { %v2810_v3 = vpop.f32.mrf.mxu1  ;;  %2195 = vmatmul.mubr.bf16.gmra.mxu1 %v4172_v1  ;;  %v4416_v19 = vadd.f32 %v2723_v10, %v2722_v29  ;;  %v782_v10 = vshrl.u32 %v4438_v30, 16 }
 0x123   : > { %v4412_v56 = vadd.f32 %v2809_v38, %v4335_v53  ;;  %2202 = vmatprep.mubr.bf16.mxu1 %v4936_v49  ;;  %v2725_v26 = vpop.f32.mrf.mxu0 }
 0x124   : > { %v2811_v39 = vpop.f32.mrf.mxu1 }
 0x125   : > { %v2812_v62 = vadd.f32 %v2811_v39, %v2810_v3  ;;  %v2726_v1 = vpop.f32.mrf.mxu0  ;;  %v785_v39 = vshll.u32 %v4438_v30, 16 }
 0x126   : > { %v2813_v44 = vpop.f32.mrf.mxu1  ;;  %v4421_v51 = vadd.f32 %v2726_v1, %v2725_v26 }
 0x127   : > { %v4419_v46 = vadd.f32 %v2812_v62, %v4348_v9  ;;  %v2728_v50 = vpop.f32.mrf.mxu0  ;;  %3173 = vmatmul.mubr.bf16.gmra.mxu0 %v4174_v27 }
 0x128   : > { %v2814_v15 = vpop.f32.mrf.mxu1  ;;  %3176 = vmatprep.mubr.bf16.mxu0 %v4187_v41 }
 0x129   : > { %v2815_v53 = vadd.f32 %v2814_v15, %v2813_v44  ;;  %v2729_v49 = vpop.f32.mrf.mxu0  ;;  %v784_v15 = vrot.slane %v782_v10, 4 }
 0x12a   : > { %v2816_v17 = vpop.f32.mrf.mxu1  ;;  %2203 = vmatmul.mubr.bf16.gmra.mxu1 %v3601_v5  ;;  %v4430_v40 = vadd.f32 %v2729_v49, %v2728_v50 }
 0x12b   : > { %v4426_v18 = vadd.f32 %v2815_v53, %v4354_v28  ;;  %2210 = vmatprep.mubr.bf16.mxu1 %v4938_v57  ;;  %v2731_v13 = vpop.f32.mrf.mxu0  ;;  %v4441_v57 = vld [vmem:[%s3516_s24 + $0xd0] sm:$0xf]  ;;  %v787_v53 = vrot.slane %v785_v39, 5 }
 0x12c   : > { %v2817_v9 = vpop.f32.mrf.mxu1  ;;  %v791_v62 = vshll.u32 %v4441_v57, 16 }
 0x12d   : > { %v2818_v22 = vadd.f32 %v2817_v9, %v2816_v17  ;;  %v2732_v60 = vpop.f32.mrf.mxu0 }
 0x12e   : > { %v2819_v54 = vpop.f32.mrf.mxu1  ;;  %v4435_v8 = vadd.f32 %v2732_v60, %v2731_v13  ;;  %v793_v50 = vrot.slane %v791_v62, 5 }
 0x12f   : > { %v4433_v5 = vadd.f32 %v2818_v22, %v4366_v21  ;;  %v2734_v41 = vpop.f32.mrf.mxu0  ;;  %3177 = vmatmul.mubr.bf16.gmra.mxu0 %v4207_v55  ;;  %v196_v22 = vld [vmem:[%s3516_s24 + $0xd4] sm:$0x1]  ;;  %s134_s24 = sand.u32 1, %s3408_s10  }
 0x130   : > { %v2820_v27 = vpop.f32.mrf.mxu1  ;;  %3180 = vmatprep.mubr.bf16.mxu0 %v4226_v12  ;;  %s2524_s25 = sshll.u32 %s134_s24, 8  ;;  %s4860_s4 = scalar_lea.sflag [#allocation3], %s134_s24 }
 0x131   : > { %v2821_v28 = vadd.f32 %v2820_v27, %v2819_v54  ;;  %v2735_v21 = vpop.f32.mrf.mxu0  ;;  %s4755_s26 = scalar_lea.vmem [#allocation2], %s2524_s25 }
 0x132   : > { %v2822_v38 = vpop.f32.mrf.mxu1  ;;  %2211 = vmatmul.mubr.bf16.gmra.mxu1 %v3630_v45  ;;  %v795_v45 = vshrl.u32 %v4441_v57, 16  ;;  %v4454_v26 = vadd.f32 %v2735_v21, %v2734_v41  ;;  %s2458_s28 = sshll.u32 %s4755_s26, 4  ;;  %s4855_s28 = int_to_ptr.vmem [resolvable:$true] %s2458_s28 }
 0x133   : > { %v4446_v29 = vadd.f32 %v2821_v28, %v4374_v4  ;;  %2218 = vmatprep.mubr.bf16.mxu1 %v4939_v37  ;;  %v2737_v4 = vpop.f32.mrf.mxu0  ;;  %v788_v28 = vor.u32 %v787_v53, %v784_v15  ;;  %s3356_s13 = scalar_lea.vmem %s4855_s28, 4096  ;;  %p3363_p0 = scmp.lt.s32.totalorder %s4855_s28, %s3361_s6 }
 0x134   : > { %v2823_v3 = vpop.f32.mrf.mxu1  ;;  %v797_v17 = vrot.slane %v795_v45, 4  ;;  %p3357_p11 = scmp.ne.s32.totalorder %s4855_s28, %s3356_s13  ;;  %p3364_p1 = scmp.lt.s32.totalorder %s3362_s7, %s3356_s13 }
 0x135   : > { %v2824_v55 = vadd.f32 %v2823_v3, %v2822_v38  ;;  %v2738_v12 = vpop.f32.mrf.mxu0  ;;  %v801_v38 = vshll.u32 %v196_v22, 16  ;;  %v789_v62 = vrot.slane %v788_v28, 4 }
 0x136   : > { %v2825_v44 = vpop.f32.mrf.mxu1  ;;  %v4459_v49 = vadd.f32 %v2738_v12, %v2737_v4  ;;  %v798_v41 = vor.u32 %v797_v17, %v793_v50  ;;  %p3358_p12 = pnand %p3357_p11, %p3474_p5  ;;  %p3365_p2 = por %p3364_p1, %p3363_p0 }
 0x137   : > { %v4457_v37 = vadd.f32 %v2824_v55, %v4388_v32  ;;  %v2740_v13 = vpop.f32.mrf.mxu0  ;;  %3181 = vmatmul.mubr.bf16.gmra.mxu0 %v4245_v48  ;;  %v794_v53 = vsel %vm3560_vm2, %v789_v62, %v793_v50 }
 0x138   : > { %v2826_v1 = vpop.f32.mrf.mxu1  ;;  %3184 = vmatprep.mubr.bf16.mxu0 %v4261_v23  ;;  %v799_v45 = vrot.slane %v798_v41, 4  ;;  %p3359_p13 = pneg %p3358_p12 }
 0x139   : > { %v2827_v9 = vadd.f32 %v2826_v1, %v2825_v44  ;;  %v2741_v32 = vpop.f32.mrf.mxu0 }
 0x13a   : > { %v2828_v54 = vpop.f32.mrf.mxu1  ;;  %2219 = vmatmul.mubr.bf16.gmra.mxu1 %v3730_v7  ;;  %v4469_v21 = vadd.f32 %v2741_v32, %v2740_v13  ;;  %v813_v13 = vrot.slane %v196_v22, 5  ;;  %p3366_p3 = pnand %p3365_p2, %p3359_p13 }
 0x13b   : > { %v4465_v60 = vadd.f32 %v2827_v9, %v4394_v47  ;;  %2226 = vmatprep.mubr.bf16.mxu1 %v4940_v31  ;;  %v2743_v10 = vpop.f32.mrf.mxu0  ;;  %v803_v31 = vrot.slane %v801_v38, 5 }
 0x13c   : > { %v2829_v27 = vpop.f32.mrf.mxu1 }
 0x13d   : > { %v2830_v3 = vadd.f32 %v2829_v27, %v2828_v54  ;;  %v2744_v48 = vpop.f32.mrf.mxu0  ;;  %v804_v17 = vsel %vm3560_vm2, %v799_v45, %v803_v31  ;;  %v2543_v54 = vrot.slane %v4438_v30, 9 }
 0x13e   : > { %v2831_v39 = vpop.f32.mrf.mxu1  ;;  %v4474_v55 = vadd.f32 %v2744_v48, %v2743_v10 }
 0x13f   : > { %v4472_v7 = vadd.f32 %v2830_v3, %v4402_v59  ;;  %v2746_v4 = vpop.f32.mrf.mxu0  ;;  %3185 = vmatmul.mubr.bf16.gmra.mxu0 %v4274_v25  ;;  %v810_v59 = vrot.slane %v4441_v57, 5 }
 0x140   : > { %v2832_v47 = vpop.f32.mrf.mxu1  ;;  %3188 = vmatprep.mubr.bf16.mxu0 %v4293_v52  ;;  %v2596_v52 = vcombine.low %v794_v53, %v804_v17 }
 0x141   : > { %v2833_v23 = vadd.f32 %v2832_v47, %v2831_v39  ;;  %v2747_v1 = vpop.f32.mrf.mxu0  ;;  %v812_v32 = vrot.slane %v810_v59, 4 }
 0x142   : > { %v2834_v44 = vpop.f32.mrf.mxu1  ;;  %2227 = vmatmul.mubr.bf16.gmra.mxu1 %v3812_v42  ;;  %v4488_v42 = vadd.f32 %v2747_v1, %v2746_v4 }
 0x143   : > { %v4479_v12 = vadd.f32 %v2833_v23, %v4407_v11  ;;  %2234 = vmatprep.mubr.bf16.mxu1 %v4384_v43  ;;  %v2749_v9 = vpop.f32.mrf.mxu0  ;;  %v814_v3 = vsel %vm3751_vm5, %v812_v32, %v813_v13 }
 0x144   : > { %v2835_v15 = vpop.f32.mrf.mxu1 }
 0x145   : > { %v2836_v25 = vadd.f32 %v2835_v15, %v2834_v44  ;;  %v2750_v27 = vpop.f32.mrf.mxu0 }
 0x146   : > { %v2837_v11 = vpop.f32.mrf.mxu1  ;;  %v4494_v41 = vadd.f32 %v2750_v27, %v2749_v9 }
 0x147   : > { %v4491_v43 = vadd.f32 %v2836_v25, %v4416_v19  ;;  %v2752_v36 = vpop.f32.mrf.mxu0  ;;  %3189 = vmatmul.mubr.bf16.gmra.mxu0 %v4309_v35  ;;  %v811_v19 = vsel %vm3751_vm5, %v2543_v54, %v810_v59  ;;  %v2595_v35 = vcombine.low %v4438_v30, %v4441_v57 }
 0x148   : > { %v2838_v28 = vpop.f32.mrf.mxu1  ;;  %3192 = vmatprep.mubr.bf16.mxu0 %v4368_v20 }
 0x149   : > { %v2839_v50 = vadd.f32 %v2838_v28, %v2837_v11  ;;  %v2753_v10 = vpop.f32.mrf.mxu0 }
 0x14a   : > { %v2840_v38 = vpop.f32.mrf.mxu1  ;;  %2235 = vmatmul.mubr.bf16.gmra.mxu1 %v4297_v61  ;;  %v4506_v48 = vadd.f32 %v2753_v10, %v2752_v36 }
 0x14b   : > { %v4499_v22 = vadd.f32 %v2839_v50, %v4421_v51  ;;  %2242 = vmatprep.mubr.bf16.mxu1 %v2596_v52  ;;  %v2755_v61 = vpop.f32.mrf.mxu0  ;;  %v2597_v51 = vcombine.low %v811_v19, %v814_v3 }
 0x14c   : > { %v2841_v39 = vpop.f32.mrf.mxu1 }
 0x14d   : > { %v2842_v47 = vadd.f32 %v2841_v39, %v2840_v38  ;;  %v2756_v20 = vpop.f32.mrf.mxu0 }
 0x14e   : > { %v2843_v62 = vpop.f32.mrf.mxu1  ;;  %v4513_v23 = vadd.f32 %v2756_v20, %v2755_v61 }
 0x14f   : > { %v4511_v45 = vadd.f32 %v2842_v47, %v4430_v40  ;;  %v2758_v4 = vpop.f32.mrf.mxu0  ;;  %3193 = vmatmul.mubr.bf16.gmra.mxu0 %v2597_v51 }
 0x150   : > { %v2844_v31 = vpop.f32.mrf.mxu1 }
 0x151   : > { %v2845_v33 = vadd.f32 %v2844_v31, %v2843_v62  ;;  %v2759_v1 = vpop.f32.mrf.mxu0 }
 0x152   : > { %v2846_v44 = vpop.f32.mrf.mxu1  ;;  %2243 = vmatmul.mubr.bf16.gmra.mxu1 %v2595_v35  ;;  %v4518_v53 = vadd.f32 %v2759_v1, %v2758_v4 }
 0x153   : > { %v4516_v59 = vadd.f32 %v2845_v33, %v4435_v8  ;;  %v2761_v57 = vpop.f32.mrf.mxu0 }
 0x154   : > { %v2847_v15 = vpop.f32.mrf.mxu1 }
 0x155   : > { %v2848_v30 = vadd.f32 %v2847_v15, %v2846_v44  ;;  %v2762_v25 = vpop.f32.mrf.mxu0 }
 0x156   : > { %v2849_v40 = vpop.f32.mrf.mxu1  ;;  %v4523_v11 = vadd.f32 %v2762_v25, %v2761_v57 }
 0x157   : > { %v4521_v17 = vadd.f32 %v2848_v30, %v4454_v26  ;;  %v2916_v54 = vpop.f32.mrf.mxu0 }
 0x158   : > { %v2850_v9 = vpop.f32.mrf.mxu1 }
 0x159   : > { %v2851_v13 = vadd.f32 %v2850_v9, %v2849_v40  ;;  %v2917_v27 = vpop.f32.mrf.mxu0 }
 0x15a   : > { %v2852_v52 = vpop.f32.mrf.mxu1  ;;  %v2918_v50 = vadd.f32 %v2917_v27, %v2916_v54 }
 0x15b   : > { %v4526_v8 = vadd.f32 %v2851_v13, %v4459_v49  ;;  %v2919_v38 = vpop.f32.mrf.mxu0 }
 0x15c   : > { %v2853_v32 = vpop.f32.mrf.mxu1  ;;  %v4532_v26 = vadd.f32 %v2918_v50, %v4405_v2 }
 0x15d   : > { %v2854_v28 = vadd.f32 %v2853_v32, %v2852_v52  ;;  %v2920_v10 = vpop.f32.mrf.mxu0 }
 0x15e   : > { %v2855_v36 = vpop.f32.mrf.mxu1  ;;  %v2921_v47 = vadd.f32 %v2920_v10, %v2919_v38 }
 0x15f   : > { %v4529_v19 = vadd.f32 %v2854_v28, %v4469_v21  ;;  %v2922_v62 = vpop.f32.mrf.mxu0 }
 0x160   : > { %v2856_v3 = vpop.f32.mrf.mxu1  ;;  %v4538_v35 = vadd.f32 %v2921_v47, %v4412_v56 }
 0x161   : > { %v2857_v39 = vadd.f32 %v2856_v3, %v2855_v36  ;;  %v2923_v20 = vpop.f32.mrf.mxu0 }
 0x162   : > { %v2858_v61 = vpop.f32.mrf.mxu1  ;;  %v2924_v21 = vadd.f32 %v2923_v20, %v2922_v62 }
 0x163   : > { %v4535_v49 = vadd.f32 %v2857_v39, %v4474_v55  ;;  %v2925_v4 = vpop.f32.mrf.mxu0 }
 0x164   : > { %v2859_v51 = vpop.f32.mrf.mxu1  ;;  %v4544_v44 = vadd.f32 %v2924_v21, %v4419_v46 }
 0x165   : > { %v2860_v31 = vadd.f32 %v2859_v51, %v2858_v61  ;;  %v2926_v15 = vpop.f32.mrf.mxu0 }
 0x166   : > { %v2861_v33 = vpop.f32.mrf.mxu1  ;;  %v2927_v55 = vadd.f32 %v2926_v15, %v2925_v4 }
 0x167   : > { %v4541_v2 = vadd.f32 %v2860_v31, %v4488_v42  ;;  %v2928_v40 = vpop.f32.mrf.mxu0 }
 0x168   : > { %v2862_v1 = vpop.f32.mrf.mxu1  ;;  %v4550_v25 = vadd.f32 %v2927_v55, %v4426_v18 }
 0x169   : > { %v2863_v30 = vadd.f32 %v2862_v1, %v2861_v33  ;;  %v2929_v13 = vpop.f32.mrf.mxu0 }
 0x16a   : > { %v2864_v57 = vpop.f32.mrf.mxu1  ;;  %v2930_v42 = vadd.f32 %v2929_v13, %v2928_v40 }
 0x16b   : > { %v4547_v56 = vadd.f32 %v2863_v30, %v4494_v41  ;;  %v2931_v32 = vpop.f32.mrf.mxu0 }
 0x16c   : > { %v2865_v9 = vpop.f32.mrf.mxu1  ;;  %v4556_v27 = vadd.f32 %v2930_v42, %v4433_v5 }
 0x16d   : > { %v2866_v52 = vadd.f32 %v2865_v9, %v2864_v57  ;;  %v2932_v50 = vpop.f32.mrf.mxu0 }
 0x16e   : > { %v2867_v54 = vpop.f32.mrf.mxu1  ;;  %v2933_v41 = vadd.f32 %v2932_v50, %v2931_v32 }
 0x16f   : > { %v4553_v46 = vadd.f32 %v2866_v52, %v4506_v48  ;;  %v2934_v3 = vpop.f32.mrf.mxu0 }
 0x170   : > { %v2868_v28 = vpop.f32.mrf.mxu1  ;;  %v4562_v10 = vadd.f32 %v2933_v41, %v4446_v29 }
 0x171   : > { %v2869_v36 = vadd.f32 %v2868_v28, %v2867_v54  ;;  %v2935_v47 = vpop.f32.mrf.mxu0 }
 0x172   : > { %v2870_v38 = vpop.f32.mrf.mxu1  ;;  %v2936_v48 = vadd.f32 %v2935_v47, %v2934_v3 }
 0x173   : > { %v4559_v18 = vadd.f32 %v2869_v36, %v4513_v23  ;;  %v2937_v51 = vpop.f32.mrf.mxu0 }
 0x174   : > { %v2871_v39 = vpop.f32.mrf.mxu1  ;;  %v4568_v20 = vadd.f32 %v2936_v48, %v4457_v37 }
 0x175   : > { %v2872_v61 = vadd.f32 %v2871_v39, %v2870_v38  ;;  %v2938_v21 = vpop.f32.mrf.mxu0 }
 0x176   : > { %v2873_v62 = vpop.f32.mrf.mxu1  ;;  %v2939_v23 = vadd.f32 %v2938_v21, %v2937_v51 }
 0x177   : > { %v4565_v5 = vadd.f32 %v2872_v61, %v4518_v53  ;;  %v2940_v1 = vpop.f32.mrf.mxu0 }
 0x178   : > { %v2874_v31 = vpop.f32.mrf.mxu1  ;;  %v4574_v15 = vadd.f32 %v2939_v23, %v4465_v60 }
 0x179   : > { %v2875_v33 = vadd.f32 %v2874_v31, %v2873_v62  ;;  %v2941_v55 = vpop.f32.mrf.mxu0 }
 0x17a   : > { %v2876_v4 = vpop.f32.mrf.mxu1  ;;  %v2942_v53 = vadd.f32 %v2941_v55, %v2940_v1 }
 0x17b   : > { %v4571_v29 = vadd.f32 %v2875_v33, %v4523_v11  ;;  %v2943_v9 = vpop.f32.mrf.mxu0 }
 0x17c   : > { %v2877_v30 = vpop.f32.mrf.mxu1  ;;  %v4580_v13 = vadd.f32 %v2942_v53, %v4472_v7 }
 0x17d   : > { %v2878_v57 = vadd.f32 %v2877_v30, %v2876_v4  ;;  %v2944_v42 = vpop.f32.mrf.mxu0 }
 0x17e   : > { %v2879_v40 = vpop.f32.mrf.mxu1  ;;  %v2945_v11 = vadd.f32 %v2944_v42, %v2943_v9 }
 0x17f   : > { %v4577_v37 = vadd.f32 %v2878_v57, %v4333_v63  ;;  %v2946_v28 = vpop.f32.mrf.mxu0 }
 0x180   : > { %v2880_v52 = vpop.f32.mrf.mxu1  ;;  %v4586_v50 = vadd.f32 %v2945_v11, %v4479_v12 }
 0x181   : > { %v2881_v54 = vadd.f32 %v2880_v52, %v2879_v40  ;;  %v2947_v41 = vpop.f32.mrf.mxu0 }
 0x182   : > { %v2882_v32 = vpop.f32.mrf.mxu1  ;;  %v2948_v63 = vadd.f32 %v2947_v41, %v2946_v28 }
 0x183   : > { %v4583_v60 = vadd.f32 %v2881_v54, %v4337_v24  ;;  %v2949_v39 = vpop.f32.mrf.mxu0 }
 0x184   : > { %v2883_v36 = vpop.f32.mrf.mxu1  ;;  %v4592_v47 = vadd.f32 %v2948_v63, %v4491_v43 }
 0x185   : > { %v2884_v38 = vadd.f32 %v2883_v36, %v2882_v32  ;;  %v2950_v48 = vpop.f32.mrf.mxu0 }
 0x186   : > { %v2885_v3 = vpop.f32.mrf.mxu1  ;;  %v2951_v24 = vadd.f32 %v2950_v48, %v2949_v39 }
 0x187   : > { %v4589_v7 = vadd.f32 %v2884_v38, %v4351_v6  ;;  %v2952_v31 = vpop.f32.mrf.mxu0 }
 0x188   : > { %v2886_v61 = vpop.f32.mrf.mxu1  ;;  %v4598_v21 = vadd.f32 %v2951_v24, %v4499_v22 }
 0x189   : > { %v2887_v62 = vadd.f32 %v2886_v61, %v2885_v3  ;;  %v2953_v23 = vpop.f32.mrf.mxu0 }
 0x18a   : > { %v2888_v51 = vpop.f32.mrf.mxu1  ;;  %v2954_v6 = vadd.f32 %v2953_v23, %v2952_v31 }
 0x18b   : > { %v4595_v12 = vadd.f32 %v2887_v62, %v4360_v34  ;;  %v2955_v30 = vpop.f32.mrf.mxu0 }
 0x18c   : > { %v2889_v33 = vpop.f32.mrf.mxu1  ;;  %v4604_v55 = vadd.f32 %v2954_v6, %v4511_v45 }
 0x18d   : > { %v2890_v4 = vadd.f32 %v2889_v33, %v2888_v51  ;;  %v2956_v53 = vpop.f32.mrf.mxu0 }
 0x18e   : > { %v2891_v1 = vpop.f32.mrf.mxu1  ;;  %v2957_v34 = vadd.f32 %v2956_v53, %v2955_v30 }
 0x18f   : > { %v4601_v43 = vadd.f32 %v2890_v4, %v4372_v14  ;;  %v2958_v52 = vpop.f32.mrf.mxu0 }
 0x190   : > { %v2892_v57 = vpop.f32.mrf.mxu1  ;;  %v4610_v42 = vadd.f32 %v2957_v34, %v4516_v59 }
 0x191   : > { %v2893_v40 = vadd.f32 %v2892_v57, %v2891_v1  ;;  %v2959_v11 = vpop.f32.mrf.mxu0 }
 0x192   : > { %v2894_v9 = vpop.f32.mrf.mxu1  ;;  %v2960_v14 = vadd.f32 %v2959_v11, %v2958_v52 }
 0x193   : > { %v4607_v22 = vadd.f32 %v2893_v40, %v4382_v16  ;;  %v2961_v36 = vpop.f32.mrf.mxu0 }
 0x194   : > { %v2895_v54 = vpop.f32.mrf.mxu1  ;;  %v4616_v41 = vadd.f32 %v2960_v14, %v4521_v17 }
 0x195   : > { %v2896_v32 = vadd.f32 %v2895_v54, %v2894_v9  ;;  %v2962_v63 = vpop.f32.mrf.mxu0 }
 0x196   : > { %v2897_v28 = vpop.f32.mrf.mxu1  ;;  %v2963_v16 = vadd.f32 %v2962_v63, %v2961_v36 }
 0x197   : > { %v4613_v45 = vadd.f32 %v2896_v32, %v4392_v0  ;;  %v2964_v39 = vpop.f32.mrf.mxu0 }
 0x198   : > { %v2898_v38 = vpop.f32.mrf.mxu1  ;;  %v4624_v48 = vadd.f32 %v2963_v16, %v4526_v8 }
 0x199   : > { %v2899_v3 = vadd.f32 %v2898_v38, %v2897_v28  ;;  %v2965_v62 = vpop.f32.mrf.mxu0 }
 0x19a   : > { %v4618_v61 = vpop.f32.mrf.mxu1  ;;  %v2966_v0 = vadd.f32 %v2965_v62, %v2964_v39 }
 0x19b   : > { %v4621_v59 = vadd.f32 %v2899_v3, %v4396_v58  ;;  %v2967_v51 = vpop.f32.mrf.mxu0 }
 0x19c   : > { %v4626_v24 = vpop.f32.mrf.mxu1  ;;  %v4631_v31 = vadd.f32 %v2966_v0, %v4529_v19 }
 0x19d   : > { %v2968_v33 = vpop.f32.mrf.mxu0 }
 0x19e   : > { %v4628_v17 = vpop.f32.mrf.mxu1  ;;  %v2969_v4 = vadd.f32 %v2968_v33, %v2967_v51 }
 0x19f   : > { %v2970_v6 = vpop.f32.mrf.mxu0 }
 0x1a0   : > { %v4633_v23 = vpop.f32.mrf.mxu1  ;;  %v4638_v8 = vadd.f32 %v2969_v4, %v4535_v49 }
 0x1a1   : > { %v2971_v1 = vpop.f32.mrf.mxu0 }
 0x1a2   : > { %v4635_v58 = vpop.f32.mrf.mxu1  ;;  %v2972_v57 = vadd.f32 %v2971_v1, %v2970_v6 }
 0x1a3   : > { %v2973_v53 = vpop.f32.mrf.mxu0 }
 0x1a4   : > { %v4640_v30 = vpop.f32.mrf.mxu1  ;;  %v4645_v19 = vadd.f32 %v2972_v57, %v4541_v2 }
 0x1a5   : > { %v2974_v34 = vpop.f32.mrf.mxu0 }
 0x1a6   : > { %v4642_v40 = vpop.f32.mrf.mxu1  ;;  %v2975_v52 = vadd.f32 %v2974_v34, %v2973_v53 }
 0x1a7   : > { %v2976_v54 = vpop.f32.mrf.mxu0 }
 0x1a8   : > { %v4647_v9 = vpop.f32.mrf.mxu1  ;;  %v4652_v49 = vadd.f32 %v2975_v52, %v4547_v56 }
 0x1a9   : > { %v2977_v32 = vpop.f32.mrf.mxu0 }
 0x1aa   : > { %v4649_v11 = vpop.f32.mrf.mxu1  ;;  %v2978_v28 = vadd.f32 %v2977_v32, %v2976_v54 }
 0x1ab   : > { %v2979_v36 = vpop.f32.mrf.mxu0 }
 0x1ac   : > { %v4654_v14 = vpop.f32.mrf.mxu1  ;;  %v4659_v2 = vadd.f32 %v2978_v28, %v4553_v46 }
 0x1ad   : > { %v2980_v63 = vpop.f32.mrf.mxu0 }
 0x1ae   : > { %v4656_v38 = vpop.f32.mrf.mxu1  ;;  %4941 = vst [vmem:[#allocation13_spill] sm:$0xff] %v4659_v2  ;;  %v2981_v16 = vadd.f32 %v2980_v63, %v2979_v36 }
 0x1af   : > { %v2982_v39 = vpop.f32.mrf.mxu0 }
 0x1b0   : > { %v4661_v3 = vpop.f32.mrf.mxu1  ;;  %v4666_v56 = vadd.f32 %v2981_v16, %v4559_v18 }
 0x1b1   : > { %v2983_v0 = vpop.f32.mrf.mxu0 }
 0x1b2   : > { %v4663_v62 = vpop.f32.mrf.mxu1  ;;  %4942 = vst [vmem:[#allocation7_spill] sm:$0xff] %v4666_v56  ;;  %v2984_v33 = vadd.f32 %v2983_v0, %v2982_v39 }
 0x1b3   : > { %v2985_v4 = vpop.f32.mrf.mxu0 }
 0x1b4   : > { %v4668_v51 = vpop.f32.mrf.mxu1  ;;  %v4673_v46 = vadd.f32 %v2984_v33, %v4565_v5 }
 0x1b5   : > { %v2986_v1 = vpop.f32.mrf.mxu0 }
 0x1b6   : > { %v4670_v6 = vpop.f32.mrf.mxu1  ;;  %4943 = vst [vmem:[#allocation9_spill] sm:$0xff] %v4673_v46  ;;  %v2987_v53 = vadd.f32 %v2986_v1, %v2985_v4 }
 0x1b7   : > { %v2988_v34 = vpop.f32.mrf.mxu0 }
 0x1b8   : > { %v4675_v57 = vpop.f32.mrf.mxu1  ;;  %v4680_v18 = vadd.f32 %v2987_v53, %v4571_v29 }
 0x1b9   : > { %v2989_v54 = vpop.f32.mrf.mxu0 }
 0x1ba   : > { %v4677_v52 = vpop.f32.mrf.mxu1  ;;  %4944 = vst [vmem:[#allocation11_spill] sm:$0xff] %v4680_v18  ;;  %v2990_v28 = vadd.f32 %v2989_v54, %v2988_v34 }
 0x1bb   : > { %v2991_v36 = vpop.f32.mrf.mxu0 }
 0x1bc   : > { %v4682_v32 = vpop.f32.mrf.mxu1  ;;  %v4687_v5 = vadd.f32 %v2990_v28, %v4577_v37 }
 0x1bd   : > { %v2992_v16 = vpop.f32.mrf.mxu0 }
 0x1be   : > { %v4684_v63 = vpop.f32.mrf.mxu1  ;;  %4945 = vst [vmem:[#allocation5_spill] sm:$0xff] %v4687_v5  ;;  %v2993_v0 = vadd.f32 %v2992_v16, %v2991_v36 }
 0x1bf   : > { %v2994_v33 = vpop.f32.mrf.mxu0 }
 0x1c0   : > { %v4689_v39 = vpop.f32.mrf.mxu1  ;;  %v4694_v29 = vadd.f32 %v2993_v0, %v4583_v60 }
 0x1c1   : > { %v2995_v1 = vpop.f32.mrf.mxu0 }
 0x1c2   : > { %v4691_v4 = vpop.f32.mrf.mxu1  ;;  %4946 = vst [vmem:[#allocation12_spill] sm:$0xff] %v4694_v29  ;;  %v2996_v34 = vadd.f32 %v2995_v1, %v2994_v33 }
 0x1c3   : > { %v2997_v54 = vpop.f32.mrf.mxu0 }
 0x1c4   : > { %v4696_v53 = vpop.f32.mrf.mxu1  ;;  %v4701_v37 = vadd.f32 %v2996_v34, %v4589_v7 }
 0x1c5   : > { %v2998_v28 = vpop.f32.mrf.mxu0 }
 0x1c6   : > { %v4698_v56 = vpop.f32.mrf.mxu1  ;;  %4947 = vst [vmem:[#allocation6_spill] sm:$0xff] %v4701_v37  ;;  %v2999_v36 = vadd.f32 %v2998_v28, %v2997_v54 }
 0x1c7   : > { %v3000_v16 = vpop.f32.mrf.mxu0 }
 0x1c8   : > { %v4703_v5 = vpop.f32.mrf.mxu1  ;;  %v4708_v60 = vadd.f32 %v2999_v36, %v4595_v12 }
 0x1c9   : > { %v3001_v0 = vpop.f32.mrf.mxu0 }
 0x1ca   : > { %v4705_v18 = vpop.f32.mrf.mxu1  ;;  %4948 = vst [vmem:[#allocation8_spill] sm:$0xff] %v4708_v60  ;;  %v3002_v33 = vadd.f32 %v3001_v0, %v3000_v16  ;;  %v3036_v16 = vadd.f32 %v4640_v30, %v4635_v58 }
 0x1cb   : > { %v3003_v1 = vpop.f32.mrf.mxu0 }
 0x1cc   : > { %v4710_v29 = vpop.f32.mrf.mxu1  ;;  %v4715_v7 = vadd.f32 %v3002_v33, %v4601_v43  ;;  %v2133_v58 = vadd.f32 %v3036_v16, %v4544_v44  ;;  %v3051_v16 = vadd.f32 %v4675_v57, %v4670_v6  ;;  %v3060_v6 = vadd.f32 %v4696_v53, %v4691_v4 }
 0x1cd   : > { %v3004_v34 = vpop.f32.mrf.mxu0  ;;  %v3063_v4 = vadd.f32 %v4703_v5, %v4698_v56 }
 0x1ce   : > { %v4712_v2 = vpop.f32.mrf.mxu1  ;;  %4949 = vst [vmem:[#allocation10_spill] sm:$0xff] %v4715_v7  ;;  %v3005_v28 = vadd.f32 %v3004_v34, %v3003_v1  ;;  %v3030_v1 = vadd.f32 %v4626_v24, %v4618_v61  ;;  %v3033_v61 = vadd.f32 %v4633_v23, %v4628_v17 }
 0x1cf   : > { %v3006_v37 = vpop.f32.mrf.mxu0 }
 0x1d0   : > { %v4717_v54 = vpop.f32.mrf.mxu1  ;;  %v4722_v12 = vadd.f32 %v3005_v28, %v4607_v22 }
 0x1d1   : > { %v3007_v36 = vpop.f32.mrf.mxu0 }
 0x1d2   : > { %v4719_v46 = vpop.f32.mrf.mxu1  ;;  %4950 = vst [vmem:[#allocation14_spill] sm:$0xff] %v4722_v12  ;;  %v3008_v43 = vadd.f32 %v3007_v36, %v3006_v37  ;;  %v3039_v12 = vadd.f32 %v4647_v9, %v4642_v40  ;;  %v2125_v36 = vadd.f32 %v3030_v1, %v4532_v26  ;;  %v3048_v40 = vadd.f32 %v4668_v51, %v4663_v62 }
 0x1d3   : > { %v3009_v0 = vpop.f32.mrf.mxu0  ;;  %v3042_v26 = vadd.f32 %v4654_v14, %v4649_v11  ;;  %v2128_v62 = vadd.f32 %v3033_v61, %v4538_v35  ;;  %v3045_v11 = vadd.f32 %v4661_v3, %v4656_v38  ;;  %v3054_v38 = vadd.f32 %v4682_v32, %v4677_v52 }
 0x1d4   : > { %v4724_v60 = vpop.f32.mrf.mxu1  ;;  %v4734_v34 = vadd.f32 %v3008_v43, %v4613_v45  ;;  %v2136_v17 = vadd.f32 %v3039_v12, %v4550_v25  ;;  %v2149_v12 = vadd.f32 %v3048_v40, %v4568_v20  ;;  %v2152_v20 = vadd.f32 %v3051_v16, %v4574_v15 }
 0x1d5   : > { %v3010_v22 = vpop.f32.mrf.mxu0  ;;  %v2141_v35 = vadd.f32 %v3042_v26, %v4556_v27  ;;  %v2144_v27 = vadd.f32 %v3045_v11, %v4562_v10  ;;  %v2165_v15 = vadd.f32 %v3060_v6, %v4592_v47  ;;  %v3057_v52 = vadd.f32 %v4689_v39, %v4684_v63 }
 0x1d6   : > { %v4729_v33 = vpop.f32.mrf.mxu1  ;;  %4951 = vst [vmem:[#allocation15_spill] sm:$0xff] %v4734_v34  ;;  %v3011_v7 = vadd.f32 %v3010_v22, %v3009_v0  ;;  %v2157_v10 = vadd.f32 %v3054_v38, %v4580_v13  ;;  %v3072_v56 = vadd.f32 %v4724_v60, %v4719_v46  ;;  %v2168_v47 = vadd.f32 %v3063_v4, %v4598_v21 }
 0x1d7   : > { %v3166_v37 = vpop.f32.mrf.mxu0  ;;  %v3066_v63 = vadd.f32 %v4710_v29, %v4705_v18  ;;  %v2160_v13 = vadd.f32 %v3057_v52, %v4586_v50  ;;  %v3069_v18 = vadd.f32 %v4717_v54, %v4712_v2 }
 0x1d8   : > { %v4738_v28 = vpop.f32.mrf.mxu1  ;;  %v4748_v45 = vadd.f32 %v3011_v7, %v4621_v59  ;;  %v2294_v24 = vadd.f32 %v3166_v37, %v2133_v58  ;;  %v2181_v21 = vadd.f32 %v3072_v56, %v4616_v41 }
 0x1d9   : > { %v2285_v34 = vpop.f32.mrf.mxu0  ;;  %v3075_v46 = vadd.f32 %v4738_v28, %v4729_v33  ;;  %v2173_v50 = vadd.f32 %v3066_v63, %v4604_v55  ;;  %v2176_v54 = vadd.f32 %v3069_v18, %v4610_v42 }
 0x1da   : > { %v4743_v30 = vpop.f32.mrf.mxu1  ;;  %2414 = vst [vmem:[%s4755_s26 + $0x10] sm:$0xff] %v2294_v24  ;;  %v2286_v44 = vadd.f32 %v2285_v34, %v2125_v36 }
 0x1db   : > { %v3167_v23 = vpop.f32.mrf.mxu0  ;;  %v2184_v28 = vadd.f32 %v3075_v46, %v4624_v48 }
 0x1dc   : > { %v4751_v43 = vpop.f32.mrf.mxu1  ;;  %2412 = vst [vmem:[%s4755_s26] sm:$0xff] %v2286_v44  ;;  %v2297_v9 = vadd.f32 %v3167_v23, %v2136_v17 }
 0x1dd   : > { %v2288_v7 = vpop.f32.mrf.mxu0 }
 0x1de   : > { %v4759_v59 = vpop.f32.mrf.mxu1  ;;  %2415 = vst [vmem:[%s4755_s26 + $0x18] sm:$0xff] %v2297_v9  ;;  %v2289_v25 = vadd.f32 %v2288_v7, %v2128_v62 }
 0x1df   : > { %v3170_v1 = vpop.f32.mrf.mxu0 }
 0x1e0   : > { %v4765_v51 = vpop.f32.mrf.mxu1  ;;  %2413 = vst [vmem:[%s4755_s26 + $0x8] sm:$0xff] %v2289_v25  ;;  %v2310_v14 = vadd.f32 %v3170_v1, %v2149_v12 }
 0x1e1   : > { %v2301_v22 = vpop.f32.mrf.mxu0 }
 0x1e2   : > { %v3082_v0 = vpop.f32.mrf.mxu1  ;;  %2418 = vst [vmem:[%s4755_s26 + $0x30] sm:$0xff] %v2310_v14  ;;  %v2302_v57 = vadd.f32 %v2301_v22, %v2141_v35  ;;  %v3078_v14 = vadd.f32 %v4751_v43, %v4743_v30 }
 0x1e3   : > { %v3171_v37 = vpop.f32.mrf.mxu0 }
 0x1e4   : > { %v3083_v34 = vpop.f32.mrf.mxu1  ;;  %2416 = vst [vmem:[%s4755_s26 + $0x20] sm:$0xff] %v2302_v57  ;;  %v2313_v3 = vadd.f32 %v3171_v37, %v2152_v20  ;;  %v3081_v57 = vadd.f32 %v4765_v51, %v4759_v59  ;;  %v2189_v43 = vadd.f32 %v3078_v14, %v4631_v31 }
 0x1e5   : > { %v2304_v24 = vpop.f32.mrf.mxu0  ;;  %v3084_v1 = vadd.f32 %v3083_v34, %v3082_v0 }
 0x1e6   : > { %v3085_v58 = vpop.f32.mrf.mxu1  ;;  %2419 = vst [vmem:[%s4755_s26 + $0x38] sm:$0xff] %v2313_v3  ;;  %v2305_v53 = vadd.f32 %v2304_v24, %v2144_v27  ;;  %v2192_v59 = vadd.f32 %v3081_v57, %v4638_v8 }
 0x1e7   : > { %v3174_v40 = vpop.f32.mrf.mxu0  ;;  %v2197_v34 = vadd.f32 %v3084_v1, %v4645_v19 }
 0x1e8   : > { %v3086_v61 = vpop.f32.mrf.mxu1  ;;  %2417 = vst [vmem:[%s4755_s26 + $0x28] sm:$0xff] %v2305_v53  ;;  %v2326_v32 = vadd.f32 %v3174_v40, %v2165_v15  ;;  %v4952_v53 = vld [vmem:[#allocation9_spill] sm:$0xff] }
 0x1e9   : > { %v2317_v17 = vpop.f32.mrf.mxu0  ;;  %v3087_v22 = vadd.f32 %v3086_v61, %v3085_v58 }
 0x1ea   : > { %v3088_v36 = vpop.f32.mrf.mxu1  ;;  %2422 = vst [vmem:[%s4755_s26 + $0x50] sm:$0xff] %v2326_v32  ;;  %v2318_v5 = vadd.f32 %v2317_v17, %v2157_v10  ;;  %v4953_v10 = vld [vmem:[#allocation13_spill] sm:$0xff] }
 0x1eb   : > { %v3175_v26 = vpop.f32.mrf.mxu0  ;;  %v2200_v38 = vadd.f32 %v3087_v22, %v4652_v49  ;;  %v4959_v22 = vld [vmem:[#allocation12_spill] sm:$0xff] }
 0x1ec   : > { %v3089_v44 = vpop.f32.mrf.mxu1  ;;  %2420 = vst [vmem:[%s4755_s26 + $0x40] sm:$0xff] %v2318_v5  ;;  %v2329_v39 = vadd.f32 %v3175_v26, %v2168_v47  ;;  %v4954_v5 = vld [vmem:[#allocation11_spill] sm:$0xff] }
 0x1ed   : > { %v2320_v62 = vpop.f32.mrf.mxu0  ;;  %v3090_v27 = vadd.f32 %v3089_v44, %v3088_v36 }
 0x1ee   : > { %v3091_v23 = vpop.f32.mrf.mxu1  ;;  %2423 = vst [vmem:[%s4755_s26 + $0x58] sm:$0xff] %v2329_v39  ;;  %v2321_v60 = vadd.f32 %v2320_v62, %v2160_v13  ;;  %v4955_v62 = vld [vmem:[#allocation7_spill] sm:$0xff] }
 0x1ef   : > { %v3178_v16 = vpop.f32.mrf.mxu0  ;;  %v2205_v36 = vadd.f32 %v3090_v27, %v4953_v10 }
 0x1f0   : > { %v3092_v9 = vpop.f32.mrf.mxu1  ;;  %2421 = vst [vmem:[%s4755_s26 + $0x48] sm:$0xff] %v2321_v60  ;;  %v2342_v29 = vadd.f32 %v3178_v16, %v2181_v21 }
 0x1f1   : > { %v2333_v12 = vpop.f32.mrf.mxu0  ;;  %v3093_v49 = vadd.f32 %v3092_v9, %v3091_v23 }
 0x1f2   : > { %v3094_v7 = vpop.f32.mrf.mxu1  ;;  %2426 = vst [vmem:[%s4755_s26 + $0x70] sm:$0xff] %v2342_v29  ;;  %v2334_v33 = vadd.f32 %v2333_v12, %v2173_v50  ;;  %v4957_v12 = vld [vmem:[#allocation5_spill] sm:$0xff] }
 0x1f3   : > { %v3179_v11 = vpop.f32.mrf.mxu0  ;;  %v2208_v23 = vadd.f32 %v3093_v49, %v4955_v62 }
 0x1f4   : > { %v3095_v25 = vpop.f32.mrf.mxu1  ;;  %2424 = vst [vmem:[%s4755_s26 + $0x60] sm:$0xff] %v2334_v33  ;;  %v2345_v2 = vadd.f32 %v3179_v11, %v2184_v28  ;;  %v4958_v11 = vld [vmem:[#allocation8_spill] sm:$0xff] }
 0x1f5   : > { %v2336_v35 = vpop.f32.mrf.mxu0  ;;  %v3096_v37 = vadd.f32 %v3095_v25, %v3094_v7  ;;  %v4956_v7 = vld [vmem:[#allocation6_spill] sm:$0xff] }
 0x1f6   : > { %v3097_v41 = vpop.f32.mrf.mxu1  ;;  %2427 = vst [vmem:[%s4755_s26 + $0x78] sm:$0xff] %v2345_v2  ;;  %v2337_v0 = vadd.f32 %v2336_v35, %v2176_v54 }
 0x1f7   : > { %v3182_v6 = vpop.f32.mrf.mxu0  ;;  %v2213_v15 = vadd.f32 %v3096_v37, %v4952_v53 }
 0x1f8   : > { %v3098_v55 = vpop.f32.mrf.mxu1  ;;  %2425 = vst [vmem:[%s4755_s26 + $0x68] sm:$0xff] %v2337_v0  ;;  %v2358_v30 = vadd.f32 %v3182_v6, %v2197_v34 }
 0x1f9   : > { %v2349_v20 = vpop.f32.mrf.mxu0  ;;  %v3099_v31 = vadd.f32 %v3098_v55, %v3097_v41 }
 0x1fa   : > { %v3100_v48 = vpop.f32.mrf.mxu1  ;;  %2430 = vst [vmem:[%s4755_s26 + $0x90] sm:$0xff] %v2358_v30  ;;  %v2350_v58 = vadd.f32 %v2349_v20, %v2189_v43 }
 0x1fb   : > { %v3183_v3 = vpop.f32.mrf.mxu0  ;;  %v2216_v47 = vadd.f32 %v3099_v31, %v4954_v5 }
 0x1fc   : > { %v3101_v42 = vpop.f32.mrf.mxu1  ;;  %2428 = vst [vmem:[%s4755_s26 + $0x80] sm:$0xff] %v2350_v58  ;;  %v2361_v61 = vadd.f32 %v3183_v3, %v2200_v38 }
 0x1fd   : > { %v2352_v24 = vpop.f32.mrf.mxu0  ;;  %v3102_v39 = vadd.f32 %v3101_v42, %v3100_v48  ;;  %v4960_v42 = vld [vmem:[#allocation10_spill] sm:$0xff] }
 0x1fe   : > { %v3103_v19 = vpop.f32.mrf.mxu1  ;;  %2431 = vst [vmem:[%s4755_s26 + $0x98] sm:$0xff] %v2361_v61  ;;  %v2353_v4 = vadd.f32 %v2352_v24, %v2192_v59  ;;  %v4961_v61 = vld [vmem:[#allocation15_spill] sm:$0xff] }
 0x1ff   : > { %v3186_v52 = vpop.f32.mrf.mxu0  ;;  %v2221_v1 = vadd.f32 %v3102_v39, %v4957_v12 }
 0x200   : > { %v3104_v51 = vpop.f32.mrf.mxu1  ;;  %2429 = vst [vmem:[%s4755_s26 + $0x88] sm:$0xff] %v2353_v4  ;;  %v2374_v32 = vadd.f32 %v3186_v52, %v2213_v15 }
 0x201   : > { %v2365_v17 = vpop.f32.mrf.mxu0  ;;  %v3105_v50 = vadd.f32 %v3104_v51, %v3103_v19  ;;  %v4962_v51 = vld [vmem:[#allocation14_spill] sm:$0xff] }
 0x202   : > { %v3106_v40 = vpop.f32.mrf.mxu1  ;;  %2434 = vst [vmem:[%s4755_s26 + $0xb0] sm:$0xff] %v2374_v32  ;;  %v2366_v56 = vadd.f32 %v2365_v17, %v2205_v36 }
 0x203   : > { %v3187_v63 = vpop.f32.mrf.mxu0  ;;  %v2224_v0 = vadd.f32 %v3105_v50, %v4959_v22 }
 0x204   : > { %v3107_v44 = vpop.f32.mrf.mxu1  ;;  %2432 = vst [vmem:[%s4755_s26 + $0xa0] sm:$0xff] %v2366_v56  ;;  %v2377_v13 = vadd.f32 %v3187_v63, %v2216_v47 }
 0x205   : > { %v3108_v8 = vadd.f32 %v3107_v44, %v3106_v40  ;;  %v2368_v46 = vpop.f32.mrf.mxu0 }
 0x206   : > { %v3109_v26 = vpop.f32.mrf.mxu1  ;;  %2435 = vst [vmem:[%s4755_s26 + $0xb8] sm:$0xff] %v2377_v13  ;;  %v2369_v21 = vadd.f32 %v2368_v46, %v2208_v23 }
 0x207   : > { %v2229_v16 = vadd.f32 %v3108_v8, %v4956_v7  ;;  %v3190_v29 = vpop.f32.mrf.mxu0 }
 0x208   : > { %v3110_v9 = vpop.f32.mrf.mxu1  ;;  %2433 = vst [vmem:[%s4755_s26 + $0xa8] sm:$0xff] %v2369_v21 }
 0x209   : > { %v3111_v60 = vadd.f32 %v3110_v9, %v3109_v26  ;;  %v2390_v25 = vadd.f32 %v3190_v29, %v2229_v16  ;;  %v2381_v28 = vpop.f32.mrf.mxu0 }
 0x20a   : > { %v3112_v18 = vpop.f32.mrf.mxu1  ;;  %v2382_v41 = vadd.f32 %v2381_v28, %v2221_v1 }
 0x20b   : > { %2438 = vst [vmem:[%s4755_s26 + $0xd0] sm:$0xff] %v2390_v25  ;;  %v2232_v14 = vadd.f32 %v3111_v60, %v4958_v11  ;;  %v3191_v54 = vpop.f32.mrf.mxu0 }
 0x20c   : > { %v3113_v33 = vpop.f32.mrf.mxu1  ;;  %2436 = vst [vmem:[%s4755_s26 + $0xc0] sm:$0xff] %v2382_v41 }
 0x20d   : > { %v3114_v55 = vadd.f32 %v3113_v33, %v3112_v18  ;;  %v2393_v35 = vadd.f32 %v3191_v54, %v2232_v14  ;;  %v2384_v48 = vpop.f32.mrf.mxu0 }
 0x20e   : > { %v3115_v2 = vpop.f32.mrf.mxu1  ;;  %v2385_v6 = vadd.f32 %v2384_v48, %v2224_v0 }
 0x20f   : > { %2439 = vst [vmem:[%s4755_s26 + $0xd8] sm:$0xff] %v2393_v35  ;;  %v3194_v30 = vpop.f32.mrf.mxu0  ;;  %v2237_v20 = vadd.f32 %v3114_v55, %v4960_v42 }
 0x210   : > { %v3116_v34 = vpop.f32.mrf.mxu1  ;;  %2437 = vst [vmem:[%s4755_s26 + $0xc8] sm:$0xff] %v2385_v6 }
 0x211   : > { %v3117_v43 = vadd.f32 %v3116_v34, %v3115_v2  ;;  %v2397_v58 = vpop.f32.mrf.mxu0 }
 0x212   : > { %v3118_v57 = vpop.f32.mrf.mxu1  ;;  %v2398_v19 = vadd.f32 %v2397_v58, %v2237_v20 }
 0x213   : > { %v3195_v27 = vpop.f32.mrf.mxu0  ;;  %v2240_v24 = vadd.f32 %v3117_v43, %v4962_v51 }
 0x214   : > { %v3119_v37 = vpop.f32.mrf.mxu1  ;;  %2440 = vst [vmem:[%s4755_s26 + $0xe0] sm:$0xff] %v2398_v19 }
 0x215   : > { %v3120_v38 = vadd.f32 %v3119_v37, %v3118_v57  ;;  %v2400_v4 = vpop.f32.mrf.mxu0 }
 0x216   : > { %v3121_v3 = vpop.f32.mrf.mxu1  ;;  %v2401_v40 = vadd.f32 %v2400_v4, %v2240_v24 }
 0x217   : > { %v2245_v59 = vadd.f32 %v3120_v38, %v4961_v61 }
 0x218   : > { %v3122_v31 = vpop.f32.mrf.mxu1  ;;  %2441 = vst [vmem:[%s4755_s26 + $0xe8] sm:$0xff] %v2401_v40 }
 0x219   : > { %v2406_v53 = vadd.f32 %v3194_v30, %v2245_v59  ;;  %v3123_v15 = vadd.f32 %v3122_v31, %v3121_v3 }
 0x21b   : > { %2442 = vst [vmem:[%s4755_s26 + $0xf0] sm:$0xff] %v2406_v53  ;;  %v2248_v52 = vadd.f32 %v3123_v15, %v4748_v45 }
 0x21d   : > { %v2409_v49 = vadd.f32 %v3195_v27, %v2248_v52 }
 0x21f   : > { %2443 = vst [vmem:[%s4755_s26 + $0xf8] sm:$0xff] %v2409_v49 }
 0x220   : > { %3369 = shalt.err (!%p3366_p3)
}
 0x221   : > { %s3370_s8 = scalar_lea.hbm %s4853_s3, 4096  ;;  %s3374_s17 = scalar_lea.hbm %s4902_s2, 8192 }
 0x222   : > { %p3371_p4 = scmp.ne.s32.totalorder %s4853_s3, %s3370_s8  ;;  %p3375_p9 = scmp.lt.s32.totalorder %s4853_s3, %s4902_s2 }
 0x223   : > { %p3376_p10 = scmp.lt.s32.totalorder %s3374_s17, %s3370_s8 }
 0x224   : > { %p3372_p7 = pnand %p3371_p4, %p3474_p5 }
 0x225   : > { %p3377_p11 = por %p3376_p10, %p3375_p9 }
 0x226   : > { %p3373_p8 = pneg %p3372_p7 }
 0x228   : > { %p3378_p12 = pnand %p3377_p11, %p3373_p8 }
 0x22a   : > { %3381 = shalt.err (!%p3378_p12)
}
 0x22b   : > { %s3419_s23 = smov 128   ;;  %s3420_s24 = smov 8  }
 0x22c   : > { %3213 = dma.vmem_to_hbm [thread:$0]  (%p3474_p5), %s4855_s28, 4096, %s4853_s3, %s4860_s4, %s3419_s23, %s3419_s23, %s3420_s24  }
 0x22d PF: > { %p3219_p13 = scmp.ge.s32.totalorder %s3416_s12, 2  ;;  %s2473_s25 = sand.u32 1, %s3404_s9  }
 0x22e   : > { %s2474_s26 = scalar_lea.sflag [#allocation3], %s2473_s25 }
 0x22f   : > { %p3216_p0 = pnand %p3219_p13, %p3478_p6 }
 0x231   : > { %p3217_p1 = pneg %p3216_p0 }
 0x233   : > { %3399 = dma.done.wait (%p3217_p1), %s2474_s26, 4096  }
 0x234   : > { %3401 = vsyncadd (%p3217_p1), %s2474_s26, 4294963200  ;;  %p12_p2 = scmp.ge.s32.totalorder %s3461_s15, 4   ;;  %s4963_s9 = smov %s3408_s10 }
 0x235   : > { %s4964_s10 = smov %s3412_s11  ;;  %s4965_s11 = smov %s3472_s18 }
 0x236   : > { %s4966_s12 = smov %s3461_s15  ;;  %14 = sbr.rel (!%p12_p2) target bundleno = 3 (0x3), region = 63 }
 0x23b   :  { %2479 = vsyncpa [#allocation3], 1 }
 0x23c   :  { %2481 = vsyncpa [#allocation3 + $0x1], 1 }

</bundles_post_ra>
